<compile_context>
chip_gen: v7x
topology: tpu7x:2x2x1
jax: 0.10.0
libtpu: 0.0.40
codegen_flags: <defaults>
</compile_context>

<pallas_src>
import numpy as np
import jax
import jax.numpy as jnp
from jax.experimental import pallas as pl
from jax.experimental.pallas import tpu as pltpu

N_HEADS = 6
_EPS = 1e-5          # torch GroupNorm default eps
_TILE_P = 512        # pair-dimension tile (grid axis); comfortably inside 32 MiB scoped VMEM
_TILE_N = 256        # agent-dimension tile for the tail kernel


def _round_up(x, m):
    return ((x + m - 1) // m) * m


# --------------------------------------------------------------------------- #
# in-kernel helpers
# --------------------------------------------------------------------------- #
def _gn1(y, g, b):
    """GroupNorm with a single group: normalize each row over channels + affine (f32)."""
    mean = jnp.mean(y, axis=-1, keepdims=True)
    var = jnp.mean(jnp.square(y - mean), axis=-1, keepdims=True)
    return (y - mean) * jax.lax.rsqrt(var + _EPS) * g + b


def _gn1_relu(y, g, b):
    return jnp.maximum(_gn1(y, g, b), 0.0)


# --------------------------------------------------------------------------- #
# kernel 1: fused q/k/v projections + GN + ReLU + gated attention (per pair)
# --------------------------------------------------------------------------- #
def _pair_kernel(agt_ref, ctx_ref, dlin_ref,
                 qw_ref, qg_ref, qb_ref,
                 kw_ref, kg_ref, kb_ref,
                 vw_ref, vg_ref, vb_ref,
                 bmat_ref, o_ref):
    a = agt_ref[...]          # (Tp, n_agt) bf16
    c = ctx_ref[...]          # (Tp, n_agt) bf16 — single tile read shared by k and v
    # Linear blocks: matmul (bf16 operands, f32 accumulate) -> GN(1 group) -> ReLU.
    # The attention `scale` is pre-folded into q's GN gamma/beta (exact: scale > 0
    # commutes with ReLU), so no extra multiply is needed here.
    q = _gn1_relu(jnp.dot(a, qw_ref[...], preferred_element_type=jnp.float32),
                  qg_ref[...], qb_ref[...])
    k = _gn1_relu(jnp.dot(c, kw_ref[...], preferred_element_type=jnp.float32),
                  kg_ref[...], kb_ref[...])
    v = _gn1_relu(jnp.dot(c, vw_ref[...], preferred_element_type=jnp.float32),
                  vg_ref[...], vb_ref[...])
    # per-head <q_h, k_h>, broadcast back to all H*D lanes with one lane-dense
    # block-diagonal 0/1 matmul (replaces the lane-sparse (P,6) intermediate).
    s = jnp.dot((q * k).astype(jnp.bfloat16), bmat_ref[...],
                preferred_element_type=jnp.float32)            # (Tp, H*D)
    x = s + dlin_ref[...]                                      # + dist linear (broadcast)
    gate = pl.reciprocal(1.0 + jnp.exp(-x), approx=True)       # sigmoid (recip on EUP)
    o_ref[...] = gate * v


def _pair_gate(agts_hi, ctx_wi, dlin, dp):
    p_pad, n_agt = agts_hi.shape
    hd = dp['q_w'].shape[1]
    tile_p = min(_TILE_P, p_pad)                  # p_pad is a power of two >= 64
    row = lambda i: (i, 0)
    rep = lambda i: (0, 0)                        # weights stay VMEM-resident across P grid
    full = lambda arr: pl.BlockSpec(arr.shape, rep)
    return pl.pallas_call(
        _pair_kernel,
        grid=(p_pad // tile_p,),
        in_specs=[pl.BlockSpec((tile_p, n_agt), row),
                  pl.BlockSpec((tile_p, n_agt), row),
                  pl.BlockSpec((tile_p, 1), row),
                  full(dp['q_w']), full(dp['q_g']), full(dp['q_b']),
                  full(dp['k_w']), full(dp['k_g']), full(dp['k_b']),
                  full(dp['v_w']), full(dp['v_g']), full(dp['v_b']),
                  full(dp['bmat'])],
        out_specs=pl.BlockSpec((tile_p, hd), row),
        out_shape=jax.ShapeDtypeStruct((p_pad, hd), jnp.float32),
        compiler_params=pltpu.CompilerParams(
            dimension_semantics=("parallel",)),
    )(agts_hi, ctx_wi, dlin,
      dp['q_w'], dp['q_g'], dp['q_b'],
      dp['k_w'], dp['k_g'], dp['k_b'],
      dp['v_w'], dp['v_g'], dp['v_b'],
      dp['bmat'])


# --------------------------------------------------------------------------- #
# kernel 2: fused tail  (to_out + agt + residual + norm + relu + linear + GN + res + relu)
# --------------------------------------------------------------------------- #
def _tail_kernel(agts_ref, scat_ref,
                 o1w_ref, o1g_ref, o1b_ref, o2w_ref,
                 agtw_ref, ng_ref, nb_ref,
                 lw_ref, lg_ref, lb_ref, o_ref):
    res = agts_ref[...]                                         # (Tn, n_agt) f32
    # to_out[0]: Linear(H*D, n_agt) = matmul -> GN -> ReLU
    o1 = _gn1_relu(jnp.dot(scat_ref[...], o1w_ref[...],
                           preferred_element_type=jnp.float32),
                   o1g_ref[...], o1b_ref[...])
    # to_out[1]: nn.Linear(n_agt, n_agt, bias=False)
    out = jnp.dot(o1.astype(jnp.bfloat16), o2w_ref[...],
                  preferred_element_type=jnp.float32)
    # agts = agt(agts) + out  -> GroupNorm -> ReLU
    a = jnp.dot(res.astype(jnp.bfloat16), agtw_ref[...],
                preferred_element_type=jnp.float32) + out
    a = _gn1_relu(a, ng_ref[...], nb_ref[...])
    # linear (act=False): matmul -> GN, then residual + ReLU
    a = _gn1(jnp.dot(a.astype(jnp.bfloat16), lw_ref[...],
                     preferred_element_type=jnp.float32),
             lg_ref[...], lb_ref[...]) + res
    o_ref[...] = jnp.maximum(a, 0.0)


def _tail_fuse(agts_pad, scat_pad, dp, tile_n):
    n_pad, n_agt = agts_pad.shape
    hd = scat_pad.shape[1]
    row = lambda i: (i, 0)
    rep = lambda i: (0, 0)
    full = lambda arr: pl.BlockSpec(arr.shape, rep)
    return pl.pallas_call(
        _tail_kernel,
        grid=(n_pad // tile_n,),
        in_specs=[pl.BlockSpec((tile_n, n_agt), row),
                  pl.BlockSpec((tile_n, hd), row),
                  full(dp['out1_w']), full(dp['out1_g']), full(dp['out1_b']),
                  full(dp['out2_w']),
                  full(dp['agt_w']), full(dp['norm_g']), full(dp['norm_b']),
                  full(dp['lin_w']), full(dp['lin_g']), full(dp['lin_b'])],
        out_specs=pl.BlockSpec((tile_n, n_agt), row),
        out_shape=jax.ShapeDtypeStruct((n_pad, n_agt), jnp.float32),
        compiler_params=pltpu.CompilerParams(
            dimension_semantics=("parallel",)),
    )(agts_pad, scat_pad,
      dp['out1_w'], dp['out1_g'], dp['out1_b'], dp['out2_w'],
      dp['agt_w'], dp['norm_g'], dp['norm_b'],
      dp['lin_w'], dp['lin_g'], dp['lin_b'])


# --------------------------------------------------------------------------- #
# cold path (len(ctx) == 0): relu(agt(agts)) -> linear(matmul+GN) -> +res -> relu
# --------------------------------------------------------------------------- #
def _cold_kernel(agts_ref, agtw_ref, lw_ref, lg_ref, lb_ref, o_ref):
    res = agts_ref[...]
    a = jnp.maximum(jnp.dot(res.astype(jnp.bfloat16), agtw_ref[...],
                            preferred_element_type=jnp.float32), 0.0)
    a = _gn1(jnp.dot(a.astype(jnp.bfloat16), lw_ref[...],
                     preferred_element_type=jnp.float32),
             lg_ref[...], lb_ref[...]) + res
    o_ref[...] = jnp.maximum(a, 0.0)


def _cold_path(dp, agts):
    n, n_agt = agts.shape
    n_pad = _round_up(n, 16)
    tile_n = n_pad if n_pad <= 512 else _TILE_N
    n_pad = _round_up(n_pad, tile_n)
    agts_p = jnp.pad(agts, ((0, n_pad - n), (0, 0)))
    row = lambda i: (i, 0)
    rep = lambda i: (0, 0)
    full = lambda arr: pl.BlockSpec(arr.shape, rep)
    out = pl.pallas_call(
        _cold_kernel,
        grid=(n_pad // tile_n,),
        in_specs=[pl.BlockSpec((tile_n, n_agt), row),
                  full(dp['agt_w']), full(dp['lin_w']),
                  full(dp['lin_g']), full(dp['lin_b'])],
        out_specs=pl.BlockSpec((tile_n, n_agt), row),
        out_shape=jax.ShapeDtypeStruct((n_pad, n_agt), jnp.float32),
        compiler_params=pltpu.CompilerParams(
            dimension_semantics=("parallel",)),
    )(agts_p, dp['agt_w'], dp['lin_w'], dp['lin_g'], dp['lin_b'])
    return out[:n]


# --------------------------------------------------------------------------- #
# jitted device portion of the hot path (gathers, two kernels, scatter)
# --------------------------------------------------------------------------- #
@jax.jit
def _att_hot(dp, agts, ctx, agt_ctrs_cat, ctx_ctrs_cat, hi_pad, wi_pad):
    n, n_agt = agts.shape
    hd = dp['q_w'].shape[1]

    # Gathers use clamped indices (pad entries of hi_pad point at row `n`); the
    # resulting pad pair rows are finite garbage and are dropped by the scatter
    # below, so GroupNorm on pad rows can never contaminate the index_add.
    hi_g = jnp.minimum(hi_pad, n - 1)
    agts_hi = agts[hi_g].astype(jnp.bfloat16)
    ctx_wi = ctx[wi_pad].astype(jnp.bfloat16)
    dvec = agt_ctrs_cat[hi_g] - ctx_ctrs_cat[wi_pad]                     # (P_pad, 2)
    wd = dp['dist_w']                                                    # nn.Linear(2, 1)
    dlin = dvec[:, 0:1] * wd[0] + dvec[:, 1:2] * wd[1] + wd[2]           # (P_pad, 1)

    pair_out = _pair_gate(agts_hi, ctx_wi, dlin, dp)                     # (P_pad, H*D) f32

    # index_add of the reference; pad rows carry index n (out of bounds) -> dropped.
    scat = jnp.zeros((n, hd), jnp.float32).at[hi_pad].add(pair_out, mode='drop')

    n_pad = _round_up(n, 16)
    tile_n = n_pad if n_pad <= 512 else _TILE_N
    n_pad = _round_up(n_pad, tile_n)
    agts_p = jnp.pad(agts, ((0, n_pad - n), (0, 0)))
    scat_p = jnp.pad(scat, ((0, n_pad - n), (0, 0))).astype(jnp.bfloat16)
    return _tail_fuse(agts_p, scat_p, dp, tile_n)[:n]


# --------------------------------------------------------------------------- #
# parameters (deterministic synthetic init; weights stored as (in, out))
# --------------------------------------------------------------------------- #
def init_att_params(key, n_agt, n_ctx):
    hd = N_HEADS * n_ctx
    ks = jax.random.split(key, 21)

    def w(k, shape, s=0.2):
        return jax.random.normal(k, shape, jnp.float32) * s

    return {
        'dist_w': jnp.concatenate([w(ks[0], (2,)), w(ks[1], (1,))]),     # [w0, w1, bias]
        'q_w': w(ks[2], (n_agt, hd)), 'q_g': 1.0 + w(ks[3], (1, hd)), 'q_b': w(ks[4], (1, hd)),
        'k_w': w(ks[5], (n_agt, hd)), 'k_g': 1.0 + w(ks[6], (1, hd)), 'k_b': w(ks[7], (1, hd)),
        'v_w': w(ks[8], (n_agt, hd)), 'v_g': 1.0 + w(ks[9], (1, hd)), 'v_b': w(ks[10], (1, hd)),
        'agt_w': w(ks[11], (n_agt, n_agt)),
        'norm_g': 1.0 + w(ks[12], (1, n_agt)), 'norm_b': w(ks[13], (1, n_agt)),
        'lin_w': w(ks[14], (n_agt, n_agt)),
        'lin_g': 1.0 + w(ks[15], (1, n_agt)), 'lin_b': w(ks[16], (1, n_agt)),
        'out1_w': w(ks[17], (hd, n_agt)),
        'out1_g': 1.0 + w(ks[18], (1, n_agt)), 'out1_b': w(ks[19], (1, n_agt)),
        'out2_w': w(ks[20], (n_agt, n_agt)),
    }


def prep_att_params(p, n_ctx):
    """Kernel-ready params: bf16 matmul operands, attention scale folded into q's
    GN affine (exact, scale>0 commutes with ReLU), block-diagonal gate matrix."""
    hd = N_HEADS * n_ctx
    scale = float(n_ctx) ** (-0.5)
    head = jnp.arange(hd) // n_ctx
    bmat = (head[:, None] == head[None, :]).astype(jnp.bfloat16)         # (H*D, H*D) 0/1
    bf = lambda x: x.astype(jnp.bfloat16)
    return {
        'dist_w': p['dist_w'],
        'q_w': bf(p['q_w']), 'q_g': p['q_g'] * scale, 'q_b': p['q_b'] * scale,
        'k_w': bf(p['k_w']), 'k_g': p['k_g'], 'k_b': p['k_b'],
        'v_w': bf(p['v_w']), 'v_g': p['v_g'], 'v_b': p['v_b'],
        'agt_w': bf(p['agt_w']), 'norm_g': p['norm_g'], 'norm_b': p['norm_b'],
        'lin_w': bf(p['lin_w']), 'lin_g': p['lin_g'], 'lin_b': p['lin_b'],
        'out1_w': bf(p['out1_w']), 'out1_g': p['out1_g'], 'out1_b': p['out1_b'],
        'out2_w': bf(p['out2_w']),
        'bmat': bmat,
    }


# --------------------------------------------------------------------------- #
# Att / M2A forward
# --------------------------------------------------------------------------- #
def att_forward(dp, agts, agt_ids, agt_ctrs, ctx, ctx_ids, ctx_ctrs, dist_th):
    n, n_agt = agts.shape

    if len(ctx) == 0:
        return _cold_path(dp, agts)

    # index_add in the reference writes zeros(N, H, n_agt) with head-dim n_ctx
    # values — valid only when n_agent == n_map (true for LaneGCN configs).
    assert dp['q_w'].shape[1] == N_HEADS * n_agt, \
        "index_add in the reference requires n_agent == n_map"

    # ---- data-dependent pair construction (host glue; mirrors the torch loop,
    #      including its "counters only advance on non-empty batches" quirk) ----
    hi_list, wi_list = [], []
    hi_count = wi_count = 0
    for i in range(len(agt_ids)):
        d = np.asarray(agt_ctrs[i])[:, None, :] - np.asarray(ctx_ctrs[i])[None, :, :]
        d = np.sqrt((d ** 2).sum(2))
        r, c = np.nonzero(d <= dist_th)
        if len(r) == 0:
            continue
        hi_list.append(r + hi_count)
        wi_list.append(c + wi_count)
        hi_count += len(agt_ids[i])
        wi_count += len(ctx_ids[i])

    if hi_list:
        hi = np.concatenate(hi_list, 0).astype(np.int32)
        wi = np.concatenate(wi_list, 0).astype(np.int32)
    else:                                   # no pairs at all -> index_add of nothing
        hi = np.zeros((0,), np.int32)
        wi = np.zeros((0,), np.int32)
    p_real = int(hi.shape[0])

    # Bucket P to a power of two (>= 64) so jit/pallas recompiles are amortized and
    # the padded length always tiles evenly by the pair-kernel grid.
    p_pad = max(64, pl.next_power_of_2(max(p_real, 1)))
    hi_pad = np.full((p_pad,), n, np.int32)   # pad rows -> OOB index, dropped at scatter
    wi_pad = np.zeros((p_pad,), np.int32)
    hi_pad[:p_real] = hi
    wi_pad[:p_real] = wi

    agt_ctrs_cat = jnp.asarray(np.concatenate([np.asarray(x) for x in agt_ctrs], 0),
                               jnp.float32)
    ctx_ctrs_cat = jnp.asarray(np.concatenate([np.asarray(x) for x in ctx_ctrs], 0),
                               jnp.float32)

    return _att_hot(dp, agts, ctx, agt_ctrs_cat, ctx_ctrs_cat,
                    jnp.asarray(hi_pad), jnp.asarray(wi_pad))


def m2a_forward(dev_params_list, config, agents, agent_ids, agent_ctrs,
                nodes, node_ids, node_ctrs):
    for dp in dev_params_list:
        agents = att_forward(dp, agents, agent_ids, agent_ctrs,
                             nodes, node_ids, node_ctrs,
                             config['map2agent_dist'])
    return agents


# --------------------------------------------------------------------------- #
# main
# --------------------------------------------------------------------------- #
if __name__ == "__main__":
    config = {'n_agent': 32, 'n_map': 32, 'map2agent_dist': 15.0}

    key = jax.random.PRNGKey(0)
    k_par, k_agt, k_ctx, k_ac, k_nc = jax.random.split(key, 5)

    raw_params = [init_att_params(k, config['n_agent'], config['n_map'])
                  for k in jax.random.split(k_par, 2)]          # 2 stacked Att layers
    dev_params = [prep_att_params(p, config['n_map']) for p in raw_params]

    agent_counts = [3, 5]       # per-batch agent counts
    node_counts = [6, 4]        # per-batch map-node counts
    agents = jax.random.normal(k_agt, (sum(agent_counts), config['n_agent']), jnp.float32)
    nodes = jax.random.normal(k_ctx, (sum(node_counts), config['n_map']), jnp.float32)

    ack = jax.random.split(k_ac, len(agent_counts))
    nck = jax.random.split(k_nc, len(node_counts))
    # Centers kept host-side (numpy): pair construction is host logic, so no
    # device->host sync is forced per layer.
    agent_ctrs = [np.asarray(jax.random.uniform(ack[i], (agent_counts[i], 2)) * 10.0)
                  for i in range(len(agent_counts))]
    node_ctrs = [np.asarray(jax.random.uniform(nck[i], (node_counts[i], 2)) * 10.0)
                 for i in range(len(node_counts))]
    agent_ids = [np.arange(c) for c in agent_counts]
    node_ids = [np.arange(c) for c in node_counts]

    out = m2a_forward(dev_params, config, agents, agent_ids, agent_ctrs,
                      nodes, node_ids, node_ctrs)
    jax.block_until_ready(out)
    assert out.shape == (sum(agent_counts), config['n_agent'])
    assert bool(jnp.all(jnp.isfinite(out)))
    print("KERNEL_OK")
</pallas_src>

<mosaic_0001>
module attributes {stable_mosaic.version = 11 : i64} {
  func.func @_pair_kernel(%arg0: i32, %arg1: memref<64x32xbf16, #tpu.memory_space<vmem>>, %arg2: memref<64x32xbf16, #tpu.memory_space<vmem>>, %arg3: memref<64x1xf32, #tpu.memory_space<vmem>>, %arg4: memref<32x192xbf16, #tpu.memory_space<vmem>>, %arg5: memref<1x192xf32, #tpu.memory_space<vmem>>, %arg6: memref<1x192xf32, #tpu.memory_space<vmem>>, %arg7: memref<32x192xbf16, #tpu.memory_space<vmem>>, %arg8: memref<1x192xf32, #tpu.memory_space<vmem>>, %arg9: memref<1x192xf32, #tpu.memory_space<vmem>>, %arg10: memref<32x192xbf16, #tpu.memory_space<vmem>>, %arg11: memref<1x192xf32, #tpu.memory_space<vmem>>, %arg12: memref<1x192xf32, #tpu.memory_space<vmem>>, %arg13: memref<192x192xbf16, #tpu.memory_space<vmem>>, %arg14: memref<64x192xf32, #tpu.memory_space<vmem>>) attributes {dimension_semantics = [#tpu.dimension_semantics<parallel>], iteration_bounds = array<i64: 1>, scalar_prefetch = 0 : i64, scratch_operands = 0 : i64, tpu.core_type = #tpu.core_type<tc>, window_params = [{transform_indices = @transform_0, window_bounds = array<i64: 64, 32>}, {transform_indices = @transform_1, window_bounds = array<i64: 64, 32>}, {transform_indices = @transform_2, window_bounds = array<i64: 64, 1>}, {pipeline_mode = #tpu.pipeline_mode<synchronous>, transform_indices = @transform_3, window_bounds = array<i64: 32, 192>}, {pipeline_mode = #tpu.pipeline_mode<synchronous>, transform_indices = @transform_4, window_bounds = array<i64: 1, 192>}, {pipeline_mode = #tpu.pipeline_mode<synchronous>, transform_indices = @transform_5, window_bounds = array<i64: 1, 192>}, {pipeline_mode = #tpu.pipeline_mode<synchronous>, transform_indices = @transform_6, window_bounds = array<i64: 32, 192>}, {pipeline_mode = #tpu.pipeline_mode<synchronous>, transform_indices = @transform_7, window_bounds = array<i64: 1, 192>}, {pipeline_mode = #tpu.pipeline_mode<synchronous>, transform_indices = @transform_8, window_bounds = array<i64: 1, 192>}, {pipeline_mode = #tpu.pipeline_mode<synchronous>, transform_indices = @transform_9, window_bounds = array<i64: 32, 192>}, {pipeline_mode = #tpu.pipeline_mode<synchronous>, transform_indices = @transform_10, window_bounds = array<i64: 1, 192>}, {pipeline_mode = #tpu.pipeline_mode<synchronous>, transform_indices = @transform_11, window_bounds = array<i64: 1, 192>}, {pipeline_mode = #tpu.pipeline_mode<synchronous>, transform_indices = @transform_12, window_bounds = array<i64: 192, 192>}, {transform_indices = @transform_13, window_bounds = array<i64: 64, 192>}]} {
    %c0 = arith.constant 0 : index
    %c0_0 = arith.constant 0 : index
    %0 = vector.load %arg1[%c0, %c0_0] : memref<64x32xbf16, #tpu.memory_space<vmem>>, vector<64x32xbf16>
    %c0_1 = arith.constant 0 : index
    %c0_2 = arith.constant 0 : index
    %1 = vector.load %arg2[%c0_1, %c0_2] : memref<64x32xbf16, #tpu.memory_space<vmem>>, vector<64x32xbf16>
    %c0_3 = arith.constant 0 : index
    %c0_4 = arith.constant 0 : index
    %2 = vector.load %arg4[%c0_3, %c0_4] : memref<32x192xbf16, #tpu.memory_space<vmem>>, vector<32x192xbf16>
    %cst = arith.constant dense<0.000000e+00> : vector<64x192xf32>
    %3 = tpu.matmul %0, %2, %cst {dimension_numbers = #tpu.dot_dimension_numbers<[1], [0], [0], [1], [0, 0, 1, 1], [], []>} : vector<64x32xbf16>, vector<32x192xbf16>, vector<64x192xf32> -> vector<64x192xf32>
    %c0_5 = arith.constant 0 : index
    %c0_6 = arith.constant 0 : index
    %4 = vector.load %arg5[%c0_5, %c0_6] : memref<1x192xf32, #tpu.memory_space<vmem>>, vector<1x192xf32>
    %c0_7 = arith.constant 0 : index
    %c0_8 = arith.constant 0 : index
    %5 = vector.load %arg6[%c0_7, %c0_8] : memref<1x192xf32, #tpu.memory_space<vmem>>, vector<1x192xf32>
    %cst_9 = arith.constant dense<0.000000e+00> : vector<64xf32>
    %6 = vector.multi_reduction <add>, %3, %cst_9 [1] : vector<64x192xf32> to vector<64xf32>
    %7 = vector.shape_cast %6 : vector<64xf32> to vector<64x1xf32>
    %cst_10 = arith.constant 1.920000e+02 : f32
    %8 = vector.broadcast %cst_10 : f32 to vector<64x1xf32>
    %9 = arith.divf %7, %8 : vector<64x1xf32>
    %10 = vector.broadcast %9 : vector<64x1xf32> to vector<64x192xf32>
    %11 = arith.subf %3, %10 : vector<64x192xf32>
    %12 = arith.mulf %11, %11 : vector<64x192xf32>
    %cst_11 = arith.constant dense<0.000000e+00> : vector<64xf32>
    %13 = vector.multi_reduction <add>, %12, %cst_11 [1] : vector<64x192xf32> to vector<64xf32>
    %14 = vector.shape_cast %13 : vector<64xf32> to vector<64x1xf32>
    %cst_12 = arith.constant 1.920000e+02 : f32
    %15 = vector.broadcast %cst_12 : f32 to vector<64x1xf32>
    %16 = arith.divf %14, %15 : vector<64x1xf32>
    %17 = vector.broadcast %9 : vector<64x1xf32> to vector<64x192xf32>
    %18 = arith.subf %3, %17 : vector<64x192xf32>
    %cst_13 = arith.constant 9.99999974E-6 : f32
    %19 = vector.broadcast %cst_13 : f32 to vector<64x1xf32>
    %20 = arith.addf %16, %19 : vector<64x1xf32>
    %21 = math.rsqrt %20 : vector<64x1xf32>
    %22 = vector.broadcast %21 : vector<64x1xf32> to vector<64x192xf32>
    %23 = arith.mulf %18, %22 : vector<64x192xf32>
    %24 = vector.broadcast %4 : vector<1x192xf32> to vector<64x192xf32>
    %25 = arith.mulf %23, %24 : vector<64x192xf32>
    %26 = vector.broadcast %5 : vector<1x192xf32> to vector<64x192xf32>
    %27 = arith.addf %25, %26 : vector<64x192xf32>
    %cst_14 = arith.constant 0.000000e+00 : f32
    %28 = vector.broadcast %cst_14 : f32 to vector<64x192xf32>
    %29 = arith.maximumf %27, %28 : vector<64x192xf32>
    %c0_15 = arith.constant 0 : index
    %c0_16 = arith.constant 0 : index
    %30 = vector.load %arg7[%c0_15, %c0_16] : memref<32x192xbf16, #tpu.memory_space<vmem>>, vector<32x192xbf16>
    %cst_17 = arith.constant dense<0.000000e+00> : vector<64x192xf32>
    %31 = tpu.matmul %1, %30, %cst_17 {dimension_numbers = #tpu.dot_dimension_numbers<[1], [0], [0], [1], [0, 0, 1, 1], [], []>} : vector<64x32xbf16>, vector<32x192xbf16>, vector<64x192xf32> -> vector<64x192xf32>
    %c0_18 = arith.constant 0 : index
    %c0_19 = arith.constant 0 : index
    %32 = vector.load %arg8[%c0_18, %c0_19] : memref<1x192xf32, #tpu.memory_space<vmem>>, vector<1x192xf32>
    %c0_20 = arith.constant 0 : index
    %c0_21 = arith.constant 0 : index
    %33 = vector.load %arg9[%c0_20, %c0_21] : memref<1x192xf32, #tpu.memory_space<vmem>>, vector<1x192xf32>
    %cst_22 = arith.constant dense<0.000000e+00> : vector<64xf32>
    %34 = vector.multi_reduction <add>, %31, %cst_22 [1] : vector<64x192xf32> to vector<64xf32>
    %35 = vector.shape_cast %34 : vector<64xf32> to vector<64x1xf32>
    %cst_23 = arith.constant 1.920000e+02 : f32
    %36 = vector.broadcast %cst_23 : f32 to vector<64x1xf32>
    %37 = arith.divf %35, %36 : vector<64x1xf32>
    %38 = vector.broadcast %37 : vector<64x1xf32> to vector<64x192xf32>
    %39 = arith.subf %31, %38 : vector<64x192xf32>
    %40 = arith.mulf %39, %39 : vector<64x192xf32>
    %cst_24 = arith.constant dense<0.000000e+00> : vector<64xf32>
    %41 = vector.multi_reduction <add>, %40, %cst_24 [1] : vector<64x192xf32> to vector<64xf32>
    %42 = vector.shape_cast %41 : vector<64xf32> to vector<64x1xf32>
    %cst_25 = arith.constant 1.920000e+02 : f32
    %43 = vector.broadcast %cst_25 : f32 to vector<64x1xf32>
    %44 = arith.divf %42, %43 : vector<64x1xf32>
    %45 = vector.broadcast %37 : vector<64x1xf32> to vector<64x192xf32>
    %46 = arith.subf %31, %45 : vector<64x192xf32>
    %cst_26 = arith.constant 9.99999974E-6 : f32
    %47 = vector.broadcast %cst_26 : f32 to vector<64x1xf32>
    %48 = arith.addf %44, %47 : vector<64x1xf32>
    %49 = math.rsqrt %48 : vector<64x1xf32>
    %50 = vector.broadcast %49 : vector<64x1xf32> to vector<64x192xf32>
    %51 = arith.mulf %46, %50 : vector<64x192xf32>
    %52 = vector.broadcast %32 : vector<1x192xf32> to vector<64x192xf32>
    %53 = arith.mulf %51, %52 : vector<64x192xf32>
    %54 = vector.broadcast %33 : vector<1x192xf32> to vector<64x192xf32>
    %55 = arith.addf %53, %54 : vector<64x192xf32>
    %cst_27 = arith.constant 0.000000e+00 : f32
    %56 = vector.broadcast %cst_27 : f32 to vector<64x192xf32>
    %57 = arith.maximumf %55, %56 : vector<64x192xf32>
    %c0_28 = arith.constant 0 : index
    %c0_29 = arith.constant 0 : index
    %58 = vector.load %arg10[%c0_28, %c0_29] : memref<32x192xbf16, #tpu.memory_space<vmem>>, vector<32x192xbf16>
    %cst_30 = arith.constant dense<0.000000e+00> : vector<64x192xf32>
    %59 = tpu.matmul %1, %58, %cst_30 {dimension_numbers = #tpu.dot_dimension_numbers<[1], [0], [0], [1], [0, 0, 1, 1], [], []>} : vector<64x32xbf16>, vector<32x192xbf16>, vector<64x192xf32> -> vector<64x192xf32>
    %c0_31 = arith.constant 0 : index
    %c0_32 = arith.constant 0 : index
    %60 = vector.load %arg11[%c0_31, %c0_32] : memref<1x192xf32, #tpu.memory_space<vmem>>, vector<1x192xf32>
    %c0_33 = arith.constant 0 : index
    %c0_34 = arith.constant 0 : index
    %61 = vector.load %arg12[%c0_33, %c0_34] : memref<1x192xf32, #tpu.memory_space<vmem>>, vector<1x192xf32>
    %cst_35 = arith.constant dense<0.000000e+00> : vector<64xf32>
    %62 = vector.multi_reduction <add>, %59, %cst_35 [1] : vector<64x192xf32> to vector<64xf32>
    %63 = vector.shape_cast %62 : vector<64xf32> to vector<64x1xf32>
    %cst_36 = arith.constant 1.920000e+02 : f32
    %64 = vector.broadcast %cst_36 : f32 to vector<64x1xf32>
    %65 = arith.divf %63, %64 : vector<64x1xf32>
    %66 = vector.broadcast %65 : vector<64x1xf32> to vector<64x192xf32>
    %67 = arith.subf %59, %66 : vector<64x192xf32>
    %68 = arith.mulf %67, %67 : vector<64x192xf32>
    %cst_37 = arith.constant dense<0.000000e+00> : vector<64xf32>
    %69 = vector.multi_reduction <add>, %68, %cst_37 [1] : vector<64x192xf32> to vector<64xf32>
    %70 = vector.shape_cast %69 : vector<64xf32> to vector<64x1xf32>
    %cst_38 = arith.constant 1.920000e+02 : f32
    %71 = vector.broadcast %cst_38 : f32 to vector<64x1xf32>
    %72 = arith.divf %70, %71 : vector<64x1xf32>
    %73 = vector.broadcast %65 : vector<64x1xf32> to vector<64x192xf32>
    %74 = arith.subf %59, %73 : vector<64x192xf32>
    %cst_39 = arith.constant 9.99999974E-6 : f32
    %75 = vector.broadcast %cst_39 : f32 to vector<64x1xf32>
    %76 = arith.addf %72, %75 : vector<64x1xf32>
    %77 = math.rsqrt %76 : vector<64x1xf32>
    %78 = vector.broadcast %77 : vector<64x1xf32> to vector<64x192xf32>
    %79 = arith.mulf %74, %78 : vector<64x192xf32>
    %80 = vector.broadcast %60 : vector<1x192xf32> to vector<64x192xf32>
    %81 = arith.mulf %79, %80 : vector<64x192xf32>
    %82 = vector.broadcast %61 : vector<1x192xf32> to vector<64x192xf32>
    %83 = arith.addf %81, %82 : vector<64x192xf32>
    %cst_40 = arith.constant 0.000000e+00 : f32
    %84 = vector.broadcast %cst_40 : f32 to vector<64x192xf32>
    %85 = arith.maximumf %83, %84 : vector<64x192xf32>
    %86 = arith.mulf %29, %57 : vector<64x192xf32>
    %87 = arith.truncf %86 : vector<64x192xf32> to vector<64x192xbf16>
    %c0_41 = arith.constant 0 : index
    %c0_42 = arith.constant 0 : index
    %88 = vector.load %arg13[%c0_41, %c0_42] : memref<192x192xbf16, #tpu.memory_space<vmem>>, vector<192x192xbf16>
    %cst_43 = arith.constant dense<0.000000e+00> : vector<64x192xf32>
    %89 = tpu.matmul %87, %88, %cst_43 {dimension_numbers = #tpu.dot_dimension_numbers<[1], [0], [0], [1], [0, 0, 1, 1], [], []>} : vector<64x192xbf16>, vector<192x192xbf16>, vector<64x192xf32> -> vector<64x192xf32>
    %c0_44 = arith.constant 0 : index
    %c0_45 = arith.constant 0 : index
    %90 = vector.load %arg3[%c0_44, %c0_45] : memref<64x1xf32, #tpu.memory_space<vmem>>, vector<64x1xf32>
    %91 = vector.broadcast %90 : vector<64x1xf32> to vector<64x192xf32>
    %92 = arith.addf %89, %91 : vector<64x192xf32>
    %cst_46 = arith.constant 0.000000e+00 : f32
    %93 = vector.broadcast %cst_46 : f32 to vector<64x192xf32>
    %94 = arith.subf %93, %92 : vector<64x192xf32>
    %95 = math.exp %94 : vector<64x192xf32>
    %cst_47 = arith.constant 1.000000e+00 : f32
    %96 = vector.broadcast %cst_47 : f32 to vector<64x192xf32>
    %97 = arith.addf %96, %95 : vector<64x192xf32>
    %98 = tpu.reciprocal %97 {approx = true} : vector<64x192xf32> -> vector<64x192xf32>
    %99 = arith.mulf %98, %85 : vector<64x192xf32>
    %c0_48 = arith.constant 0 : index
    %c0_49 = arith.constant 0 : index
    %100 = vector.load %arg14[%c0_48, %c0_49] : memref<64x192xf32, #tpu.memory_space<vmem>>, vector<64x192xf32>
    tpu.vector_store %arg14[%c0_48, %c0_49], %99 {strides = array<i32>} : memref<64x192xf32, #tpu.memory_space<vmem>>, vector<64x192xf32>,
    return
  }
  func.func @transform_0(%arg0: i32) -> (i32, i32) {
    %c0_i32 = arith.constant 0 : i32
    %c0_i32_0 = arith.constant 0 : i32
    return %arg0, %c0_i32 : i32, i32
  }
  func.func @transform_1(%arg0: i32) -> (i32, i32) {
    %c0_i32 = arith.constant 0 : i32
    %c0_i32_0 = arith.constant 0 : i32
    return %arg0, %c0_i32 : i32, i32
  }
  func.func @transform_2(%arg0: i32) -> (i32, i32) {
    %c0_i32 = arith.constant 0 : i32
    %c0_i32_0 = arith.constant 0 : i32
    return %arg0, %c0_i32 : i32, i32
  }
  func.func @transform_3(%arg0: i32) -> (i32, i32) {
    %c0_i32 = arith.constant 0 : i32
    %c0_i32_0 = arith.constant 0 : i32
    %c0_i32_1 = arith.constant 0 : i32
    return %c0_i32, %c0_i32_0 : i32, i32
  }
  func.func @transform_4(%arg0: i32) -> (i32, i32) {
    %c0_i32 = arith.constant 0 : i32
    %c0_i32_0 = arith.constant 0 : i32
    %c0_i32_1 = arith.constant 0 : i32
    return %c0_i32, %c0_i32_0 : i32, i32
  }
  func.func @transform_5(%arg0: i32) -> (i32, i32) {
    %c0_i32 = arith.constant 0 : i32
    %c0_i32_0 = arith.constant 0 : i32
    %c0_i32_1 = arith.constant 0 : i32
    return %c0_i32, %c0_i32_0 : i32, i32
  }
  func.func @transform_6(%arg0: i32) -> (i32, i32) {
    %c0_i32 = arith.constant 0 : i32
    %c0_i32_0 = arith.constant 0 : i32
    %c0_i32_1 = arith.constant 0 : i32
    return %c0_i32, %c0_i32_0 : i32, i32
  }
  func.func @transform_7(%arg0: i32) -> (i32, i32) {
    %c0_i32 = arith.constant 0 : i32
    %c0_i32_0 = arith.constant 0 : i32
    %c0_i32_1 = arith.constant 0 : i32
    return %c0_i32, %c0_i32_0 : i32, i32
  }
  func.func @transform_8(%arg0: i32) -> (i32, i32) {
    %c0_i32 = arith.constant 0 : i32
    %c0_i32_0 = arith.constant 0 : i32
    %c0_i32_1 = arith.constant 0 : i32
    return %c0_i32, %c0_i32_0 : i32, i32
  }
  func.func @transform_9(%arg0: i32) -> (i32, i32) {
    %c0_i32 = arith.constant 0 : i32
    %c0_i32_0 = arith.constant 0 : i32
    %c0_i32_1 = arith.constant 0 : i32
    return %c0_i32, %c0_i32_0 : i32, i32
  }
  func.func @transform_10(%arg0: i32) -> (i32, i32) {
    %c0_i32 = arith.constant 0 : i32
    %c0_i32_0 = arith.constant 0 : i32
    %c0_i32_1 = arith.constant 0 : i32
    return %c0_i32, %c0_i32_0 : i32, i32
  }
  func.func @transform_11(%arg0: i32) -> (i32, i32) {
    %c0_i32 = arith.constant 0 : i32
    %c0_i32_0 = arith.constant 0 : i32
    %c0_i32_1 = arith.constant 0 : i32
    return %c0_i32, %c0_i32_0 : i32, i32
  }
  func.func @transform_12(%arg0: i32) -> (i32, i32) {
    %c0_i32 = arith.constant 0 : i32
    %c0_i32_0 = arith.constant 0 : i32
    %c0_i32_1 = arith.constant 0 : i32
    return %c0_i32, %c0_i32_0 : i32, i32
  }
  func.func @transform_13(%arg0: i32) -> (i32, i32) {
    %c0_i32 = arith.constant 0 : i32
    %c0_i32_0 = arith.constant 0 : i32
    return %arg0, %c0_i32 : i32, i32
  }
}

module attributes {stable_mosaic.version = 11 : i64} {
  func.func @_tail_kernel(%arg0: i32, %arg1: memref<16x32xf32, #tpu.memory_space<vmem>>, %arg2: memref<16x192xbf16, #tpu.memory_space<vmem>>, %arg3: memref<192x32xbf16, #tpu.memory_space<vmem>>, %arg4: memref<1x32xf32, #tpu.memory_space<vmem>>, %arg5: memref<1x32xf32, #tpu.memory_space<vmem>>, %arg6: memref<32x32xbf16, #tpu.memory_space<vmem>>, %arg7: memref<32x32xbf16, #tpu.memory_space<vmem>>, %arg8: memref<1x32xf32, #tpu.memory_space<vmem>>, %arg9: memref<1x32xf32, #tpu.memory_space<vmem>>, %arg10: memref<32x32xbf16, #tpu.memory_space<vmem>>, %arg11: memref<1x32xf32, #tpu.memory_space<vmem>>, %arg12: memref<1x32xf32, #tpu.memory_space<vmem>>, %arg13: memref<16x32xf32, #tpu.memory_space<vmem>>) attributes {dimension_semantics = [#tpu.dimension_semantics<parallel>], iteration_bounds = array<i64: 1>, scalar_prefetch = 0 : i64, scratch_operands = 0 : i64, tpu.core_type = #tpu.core_type<tc>, window_params = [{transform_indices = @transform_0, window_bounds = array<i64: 16, 32>}, {transform_indices = @transform_1, window_bounds = array<i64: 16, 192>}, {pipeline_mode = #tpu.pipeline_mode<synchronous>, transform_indices = @transform_2, window_bounds = array<i64: 192, 32>}, {pipeline_mode = #tpu.pipeline_mode<synchronous>, transform_indices = @transform_3, window_bounds = array<i64: 1, 32>}, {pipeline_mode = #tpu.pipeline_mode<synchronous>, transform_indices = @transform_4, window_bounds = array<i64: 1, 32>}, {pipeline_mode = #tpu.pipeline_mode<synchronous>, transform_indices = @transform_5, window_bounds = array<i64: 32, 32>}, {pipeline_mode = #tpu.pipeline_mode<synchronous>, transform_indices = @transform_6, window_bounds = array<i64: 32, 32>}, {pipeline_mode = #tpu.pipeline_mode<synchronous>, transform_indices = @transform_7, window_bounds = array<i64: 1, 32>}, {pipeline_mode = #tpu.pipeline_mode<synchronous>, transform_indices = @transform_8, window_bounds = array<i64: 1, 32>}, {pipeline_mode = #tpu.pipeline_mode<synchronous>, transform_indices = @transform_9, window_bounds = array<i64: 32, 32>}, {pipeline_mode = #tpu.pipeline_mode<synchronous>, transform_indices = @transform_10, window_bounds = array<i64: 1, 32>}, {pipeline_mode = #tpu.pipeline_mode<synchronous>, transform_indices = @transform_11, window_bounds = array<i64: 1, 32>}, {transform_indices = @transform_12, window_bounds = array<i64: 16, 32>}]} {
    %c0 = arith.constant 0 : index
    %c0_0 = arith.constant 0 : index
    %0 = vector.load %arg1[%c0, %c0_0] : memref<16x32xf32, #tpu.memory_space<vmem>>, vector<16x32xf32>
    %c0_1 = arith.constant 0 : index
    %c0_2 = arith.constant 0 : index
    %1 = vector.load %arg2[%c0_1, %c0_2] : memref<16x192xbf16, #tpu.memory_space<vmem>>, vector<16x192xbf16>
    %c0_3 = arith.constant 0 : index
    %c0_4 = arith.constant 0 : index
    %2 = vector.load %arg3[%c0_3, %c0_4] : memref<192x32xbf16, #tpu.memory_space<vmem>>, vector<192x32xbf16>
    %cst = arith.constant dense<0.000000e+00> : vector<16x32xf32>
    %3 = tpu.matmul %1, %2, %cst {dimension_numbers = #tpu.dot_dimension_numbers<[1], [0], [0], [1], [0, 0, 1, 1], [], []>} : vector<16x192xbf16>, vector<192x32xbf16>, vector<16x32xf32> -> vector<16x32xf32>
    %c0_5 = arith.constant 0 : index
    %c0_6 = arith.constant 0 : index
    %4 = vector.load %arg4[%c0_5, %c0_6] : memref<1x32xf32, #tpu.memory_space<vmem>>, vector<1x32xf32>
    %c0_7 = arith.constant 0 : index
    %c0_8 = arith.constant 0 : index
    %5 = vector.load %arg5[%c0_7, %c0_8] : memref<1x32xf32, #tpu.memory_space<vmem>>, vector<1x32xf32>
    %cst_9 = arith.constant dense<0.000000e+00> : vector<16xf32>
    %6 = vector.multi_reduction <add>, %3, %cst_9 [1] : vector<16x32xf32> to vector<16xf32>
    %7 = vector.shape_cast %6 : vector<16xf32> to vector<16x1xf32>
    %cst_10 = arith.constant 3.200000e+01 : f32
    %8 = vector.broadcast %cst_10 : f32 to vector<16x1xf32>
    %9 = arith.divf %7, %8 : vector<16x1xf32>
    %10 = vector.broadcast %9 : vector<16x1xf32> to vector<16x32xf32>
    %11 = arith.subf %3, %10 : vector<16x32xf32>
    %12 = arith.mulf %11, %11 : vector<16x32xf32>
    %cst_11 = arith.constant dense<0.000000e+00> : vector<16xf32>
    %13 = vector.multi_reduction <add>, %12, %cst_11 [1] : vector<16x32xf32> to vector<16xf32>
    %14 = vector.shape_cast %13 : vector<16xf32> to vector<16x1xf32>
    %cst_12 = arith.constant 3.200000e+01 : f32
    %15 = vector.broadcast %cst_12 : f32 to vector<16x1xf32>
    %16 = arith.divf %14, %15 : vector<16x1xf32>
    %17 = vector.broadcast %9 : vector<16x1xf32> to vector<16x32xf32>
    %18 = arith.subf %3, %17 : vector<16x32xf32>
    %cst_13 = arith.constant 9.99999974E-6 : f32
    %19 = vector.broadcast %cst_13 : f32 to vector<16x1xf32>
    %20 = arith.addf %16, %19 : vector<16x1xf32>
    %21 = math.rsqrt %20 : vector<16x1xf32>
    %22 = vector.broadcast %21 : vector<16x1xf32> to vector<16x32xf32>
    %23 = arith.mulf %18, %22 : vector<16x32xf32>
    %24 = vector.broadcast %4 : vector<1x32xf32> to vector<16x32xf32>
    %25 = arith.mulf %23, %24 : vector<16x32xf32>
    %26 = vector.broadcast %5 : vector<1x32xf32> to vector<16x32xf32>
    %27 = arith.addf %25, %26 : vector<16x32xf32>
    %cst_14 = arith.constant 0.000000e+00 : f32
    %28 = vector.broadcast %cst_14 : f32 to vector<16x32xf32>
    %29 = arith.maximumf %27, %28 : vector<16x32xf32>
    %30 = arith.truncf %29 : vector<16x32xf32> to vector<16x32xbf16>
    %c0_15 = arith.constant 0 : index
    %c0_16 = arith.constant 0 : index
    %31 = vector.load %arg6[%c0_15, %c0_16] : memref<32x32xbf16, #tpu.memory_space<vmem>>, vector<32x32xbf16>
    %cst_17 = arith.constant dense<0.000000e+00> : vector<16x32xf32>
    %32 = tpu.matmul %30, %31, %cst_17 {dimension_numbers = #tpu.dot_dimension_numbers<[1], [0], [0], [1], [0, 0, 1, 1], [], []>} : vector<16x32xbf16>, vector<32x32xbf16>, vector<16x32xf32> -> vector<16x32xf32>
    %33 = arith.truncf %0 : vector<16x32xf32> to vector<16x32xbf16>
    %c0_18 = arith.constant 0 : index
    %c0_19 = arith.constant 0 : index
    %34 = vector.load %arg7[%c0_18, %c0_19] : memref<32x32xbf16, #tpu.memory_space<vmem>>, vector<32x32xbf16>
    %cst_20 = arith.constant dense<0.000000e+00> : vector<16x32xf32>
    %35 = tpu.matmul %33, %34, %cst_20 {dimension_numbers = #tpu.dot_dimension_numbers<[1], [0], [0], [1], [0, 0, 1, 1], [], []>} : vector<16x32xbf16>, vector<32x32xbf16>, vector<16x32xf32> -> vector<16x32xf32>
    %36 = arith.addf %35, %32 : vector<16x32xf32>
    %c0_21 = arith.constant 0 : index
    %c0_22 = arith.constant 0 : index
    %37 = vector.load %arg8[%c0_21, %c0_22] : memref<1x32xf32, #tpu.memory_space<vmem>>, vector<1x32xf32>
    %c0_23 = arith.constant 0 : index
    %c0_24 = arith.constant 0 : index
    %38 = vector.load %arg9[%c0_23, %c0_24] : memref<1x32xf32, #tpu.memory_space<vmem>>, vector<1x32xf32>
    %cst_25 = arith.constant dense<0.000000e+00> : vector<16xf32>
    %39 = vector.multi_reduction <add>, %36, %cst_25 [1] : vector<16x32xf32> to vector<16xf32>
    %40 = vector.shape_cast %39 : vector<16xf32> to vector<16x1xf32>
    %cst_26 = arith.constant 3.200000e+01 : f32
    %41 = vector.broadcast %cst_26 : f32 to vector<16x1xf32>
    %42 = arith.divf %40, %41 : vector<16x1xf32>
    %43 = vector.broadcast %42 : vector<16x1xf32> to vector<16x32xf32>
    %44 = arith.subf %36, %43 : vector<16x32xf32>
    %45 = arith.mulf %44, %44 : vector<16x32xf32>
    %cst_27 = arith.constant dense<0.000000e+00> : vector<16xf32>
    %46 = vector.multi_reduction <add>, %45, %cst_27 [1] : vector<16x32xf32> to vector<16xf32>
    %47 = vector.shape_cast %46 : vector<16xf32> to vector<16x1xf32>
    %cst_28 = arith.constant 3.200000e+01 : f32
    %48 = vector.broadcast %cst_28 : f32 to vector<16x1xf32>
    %49 = arith.divf %47, %48 : vector<16x1xf32>
    %50 = vector.broadcast %42 : vector<16x1xf32> to vector<16x32xf32>
    %51 = arith.subf %36, %50 : vector<16x32xf32>
    %cst_29 = arith.constant 9.99999974E-6 : f32
    %52 = vector.broadcast %cst_29 : f32 to vector<16x1xf32>
    %53 = arith.addf %49, %52 : vector<16x1xf32>
    %54 = math.rsqrt %53 : vector<16x1xf32>
    %55 = vector.broadcast %54 : vector<16x1xf32> to vector<16x32xf32>
    %56 = arith.mulf %51, %55 : vector<16x32xf32>
    %57 = vector.broadcast %37 : vector<1x32xf32> to vector<16x32xf32>
    %58 = arith.mulf %56, %57 : vector<16x32xf32>
    %59 = vector.broadcast %38 : vector<1x32xf32> to vector<16x32xf32>
    %60 = arith.addf %58, %59 : vector<16x32xf32>
    %cst_30 = arith.constant 0.000000e+00 : f32
    %61 = vector.broadcast %cst_30 : f32 to vector<16x32xf32>
    %62 = arith.maximumf %60, %61 : vector<16x32xf32>
    %63 = arith.truncf %62 : vector<16x32xf32> to vector<16x32xbf16>
    %c0_31 = arith.constant 0 : index
    %c0_32 = arith.constant 0 : index
    %64 = vector.load %arg10[%c0_31, %c0_32] : memref<32x32xbf16, #tpu.memory_space<vmem>>, vector<32x32xbf16>
    %cst_33 = arith.constant dense<0.000000e+00> : vector<16x32xf32>
    %65 = tpu.matmul %63, %64, %cst_33 {dimension_numbers = #tpu.dot_dimension_numbers<[1], [0], [0], [1], [0, 0, 1, 1], [], []>} : vector<16x32xbf16>, vector<32x32xbf16>, vector<16x32xf32> -> vector<16x32xf32>
    %c0_34 = arith.constant 0 : index
    %c0_35 = arith.constant 0 : index
    %66 = vector.load %arg11[%c0_34, %c0_35] : memref<1x32xf32, #tpu.memory_space<vmem>>, vector<1x32xf32>
    %c0_36 = arith.constant 0 : index
    %c0_37 = arith.constant 0 : index
    %67 = vector.load %arg12[%c0_36, %c0_37] : memref<1x32xf32, #tpu.memory_space<vmem>>, vector<1x32xf32>
    %cst_38 = arith.constant dense<0.000000e+00> : vector<16xf32>
    %68 = vector.multi_reduction <add>, %65, %cst_38 [1] : vector<16x32xf32> to vector<16xf32>
    %69 = vector.shape_cast %68 : vector<16xf32> to vector<16x1xf32>
    %cst_39 = arith.constant 3.200000e+01 : f32
    %70 = vector.broadcast %cst_39 : f32 to vector<16x1xf32>
    %71 = arith.divf %69, %70 : vector<16x1xf32>
    %72 = vector.broadcast %71 : vector<16x1xf32> to vector<16x32xf32>
    %73 = arith.subf %65, %72 : vector<16x32xf32>
    %74 = arith.mulf %73, %73 : vector<16x32xf32>
    %cst_40 = arith.constant dense<0.000000e+00> : vector<16xf32>
    %75 = vector.multi_reduction <add>, %74, %cst_40 [1] : vector<16x32xf32> to vector<16xf32>
    %76 = vector.shape_cast %75 : vector<16xf32> to vector<16x1xf32>
    %cst_41 = arith.constant 3.200000e+01 : f32
    %77 = vector.broadcast %cst_41 : f32 to vector<16x1xf32>
    %78 = arith.divf %76, %77 : vector<16x1xf32>
    %79 = vector.broadcast %71 : vector<16x1xf32> to vector<16x32xf32>
    %80 = arith.subf %65, %79 : vector<16x32xf32>
    %cst_42 = arith.constant 9.99999974E-6 : f32
    %81 = vector.broadcast %cst_42 : f32 to vector<16x1xf32>
    %82 = arith.addf %78, %81 : vector<16x1xf32>
    %83 = math.rsqrt %82 : vector<16x1xf32>
    %84 = vector.broadcast %83 : vector<16x1xf32> to vector<16x32xf32>
    %85 = arith.mulf %80, %84 : vector<16x32xf32>
    %86 = vector.broadcast %66 : vector<1x32xf32> to vector<16x32xf32>
    %87 = arith.mulf %85, %86 : vector<16x32xf32>
    %88 = vector.broadcast %67 : vector<1x32xf32> to vector<16x32xf32>
    %89 = arith.addf %87, %88 : vector<16x32xf32>
    %90 = arith.addf %89, %0 : vector<16x32xf32>
    %cst_43 = arith.constant 0.000000e+00 : f32
    %91 = vector.broadcast %cst_43 : f32 to vector<16x32xf32>
    %92 = arith.maximumf %90, %91 : vector<16x32xf32>
    %c0_44 = arith.constant 0 : index
    %c0_45 = arith.constant 0 : index
    %93 = vector.load %arg13[%c0_44, %c0_45] : memref<16x32xf32, #tpu.memory_space<vmem>>, vector<16x32xf32>
    tpu.vector_store %arg13[%c0_44, %c0_45], %92 {strides = array<i32>} : memref<16x32xf32, #tpu.memory_space<vmem>>, vector<16x32xf32>,
    return
  }
  func.func @transform_0(%arg0: i32) -> (i32, i32) {
    %c0_i32 = arith.constant 0 : i32
    %c0_i32_0 = arith.constant 0 : i32
    return %arg0, %c0_i32 : i32, i32
  }
  func.func @transform_1(%arg0: i32) -> (i32, i32) {
    %c0_i32 = arith.constant 0 : i32
    %c0_i32_0 = arith.constant 0 : i32
    return %arg0, %c0_i32 : i32, i32
  }
  func.func @transform_2(%arg0: i32) -> (i32, i32) {
    %c0_i32 = arith.constant 0 : i32
    %c0_i32_0 = arith.constant 0 : i32
    %c0_i32_1 = arith.constant 0 : i32
    return %c0_i32, %c0_i32_0 : i32, i32
  }
  func.func @transform_3(%arg0: i32) -> (i32, i32) {
    %c0_i32 = arith.constant 0 : i32
    %c0_i32_0 = arith.constant 0 : i32
    %c0_i32_1 = arith.constant 0 : i32
    return %c0_i32, %c0_i32_0 : i32, i32
  }
  func.func @transform_4(%arg0: i32) -> (i32, i32) {
    %c0_i32 = arith.constant 0 : i32
    %c0_i32_0 = arith.constant 0 : i32
    %c0_i32_1 = arith.constant 0 : i32
    return %c0_i32, %c0_i32_0 : i32, i32
  }
  func.func @transform_5(%arg0: i32) -> (i32, i32) {
    %c0_i32 = arith.constant 0 : i32
    %c0_i32_0 = arith.constant 0 : i32
    %c0_i32_1 = arith.constant 0 : i32
    return %c0_i32, %c0_i32_0 : i32, i32
  }
  func.func @transform_6(%arg0: i32) -> (i32, i32) {
    %c0_i32 = arith.constant 0 : i32
    %c0_i32_0 = arith.constant 0 : i32
    %c0_i32_1 = arith.constant 0 : i32
    return %c0_i32, %c0_i32_0 : i32, i32
  }
  func.func @transform_7(%arg0: i32) -> (i32, i32) {
    %c0_i32 = arith.constant 0 : i32
    %c0_i32_0 = arith.constant 0 : i32
    %c0_i32_1 = arith.constant 0 : i32
    return %c0_i32, %c0_i32_0 : i32, i32
  }
  func.func @transform_8(%arg0: i32) -> (i32, i32) {
    %c0_i32 = arith.constant 0 : i32
    %c0_i32_0 = arith.constant 0 : i32
    %c0_i32_1 = arith.constant 0 : i32
    return %c0_i32, %c0_i32_0 : i32, i32
  }
  func.func @transform_9(%arg0: i32) -> (i32, i32) {
    %c0_i32 = arith.constant 0 : i32
    %c0_i32_0 = arith.constant 0 : i32
    %c0_i32_1 = arith.constant 0 : i32
    return %c0_i32, %c0_i32_0 : i32, i32
  }
  func.func @transform_10(%arg0: i32) -> (i32, i32) {
    %c0_i32 = arith.constant 0 : i32
    %c0_i32_0 = arith.constant 0 : i32
    %c0_i32_1 = arith.constant 0 : i32
    return %c0_i32, %c0_i32_0 : i32, i32
  }
  func.func @transform_11(%arg0: i32) -> (i32, i32) {
    %c0_i32 = arith.constant 0 : i32
    %c0_i32_0 = arith.constant 0 : i32
    %c0_i32_1 = arith.constant 0 : i32
    return %c0_i32, %c0_i32_0 : i32, i32
  }
  func.func @transform_12(%arg0: i32) -> (i32, i32) {
    %c0_i32 = arith.constant 0 : i32
    %c0_i32_0 = arith.constant 0 : i32
    return %arg0, %c0_i32 : i32, i32
  }
}

</mosaic_0001>

<bundles_post_ra>
// kernel: sub.1
= control target key start
LH: loop header
LB: loop body
LE: loop exit
PB: predicated region body
PF: predicated region fallthrough
CT: control target
= control target key end

     0   :  { %s188_s0 = inlined_call_operand.vmem [shape: f32[64,2], index: 0, kind: input, shape index: {}]   ;;  %s189_s1 = inlined_call_operand.vmem [shape: f32[64,2], index: 1, kind: input, shape index: {}]   ;;  %s190_s2 = inlined_call_operand.vmem [shape: f32[64,2], index: 2, kind: output, shape index: {}]  }
   0x1   :  { %v3_v0 = vld [vmem:[%s188_s0] sm:$0xff]  ;;  %v80_v2 = vld [vmem:[%s188_s0 + $0x8] sm:$0xff]  ;;  %v83_v5 = vld [vmem:[%s188_s0 + $0x10] sm:$0xff] }
   0x2   :  { %v4_v1 = vld [vmem:[%s189_s1] sm:$0xff]  ;;  %v81_v4 = vld [vmem:[%s189_s1 + $0x8] sm:$0xff]  ;;  %v84_v6 = vld [vmem:[%s189_s1 + $0x10] sm:$0xff] }
   0x3   :  { %v7_v3 = vsub.f32 %v3_v0, %v4_v1  ;;  %v16_v7 = vsub.f32 %v80_v2, %v81_v4  ;;  %v26_v8 = vsub.f32 %v83_v5, %v84_v6  ;;  %v86_v9 = vld [vmem:[%s188_s0 + $0x18] sm:$0xff]  ;;  %v89_v11 = vld [vmem:[%s188_s0 + $0x20] sm:$0xff]  ;;  %v92_v14 = vld [vmem:[%s188_s0 + $0x28] sm:$0xff] }
   0x4   :  { %v87_v10 = vld [vmem:[%s189_s1 + $0x18] sm:$0xff]  ;;  %v90_v13 = vld [vmem:[%s189_s1 + $0x20] sm:$0xff]  ;;  %v93_v15 = vld [vmem:[%s189_s1 + $0x28] sm:$0xff] }
   0x5   :  { %9 = vst [vmem:[%s190_s2] sm:$0xff] %v7_v3  ;;  %v36_v12 = vsub.f32 %v86_v9, %v87_v10  ;;  %82 = vst [vmem:[%s190_s2 + $0x8] sm:$0xff] %v16_v7  ;;  %v46_v16 = vsub.f32 %v89_v11, %v90_v13  ;;  %v56_v17 = vsub.f32 %v92_v14, %v93_v15  ;;  %v95_v18 = vld [vmem:[%s188_s0 + $0x30] sm:$0xff]  ;;  %v98_v20 = vld [vmem:[%s188_s0 + $0x38] sm:$0xff] }
   0x6   :  { %85 = vst [vmem:[%s190_s2 + $0x10] sm:$0xff] %v26_v8  ;;  %v96_v19 = vld [vmem:[%s189_s1 + $0x30] sm:$0xff]  ;;  %v99_v22 = vld [vmem:[%s189_s1 + $0x38] sm:$0xff] }
   0x7   :  { %88 = vst [vmem:[%s190_s2 + $0x18] sm:$0xff] %v36_v12  ;;  %v66_v21 = vsub.f32 %v95_v18, %v96_v19  ;;  %91 = vst [vmem:[%s190_s2 + $0x20] sm:$0xff] %v46_v16  ;;  %v76_v23 = vsub.f32 %v98_v20, %v99_v22 }
   0x8   :  { %94 = vst [vmem:[%s190_s2 + $0x28] sm:$0xff] %v56_v17 }
   0x9   :  { %97 = vst [vmem:[%s190_s2 + $0x30] sm:$0xff] %v66_v21  ;;  %100 = vst [vmem:[%s190_s2 + $0x38] sm:$0xff] %v76_v23 }

// kernel: _att_hot.3
= control target key start
LH: loop header
LB: loop body
LE: loop exit
PB: predicated region body
PF: predicated region fallthrough
CT: control target
= control target key end

     0   :  { %v630_v0 = vmov 0   ;;  %vm151_vm0 = vcmask 523264   ;;  %vm198_vm1 = vcmask 261120   ;;  %v631_v31 = vmov 0.0   ;;  %s825_s2 = inlined_call_operand.vmem [shape: bf16[192,32], index: 2, kind: input, shape index: {}]   ;;  %s826_s1 = inlined_call_operand.vmem [shape: bf16[16,192], index: 1, kind: input, shape index: {}]   ;;  %s827_s5 = inlined_call_operand.vmem [shape: bf16[32,32], index: 5, kind: input, shape index: {}]   ;;  %s828_s6 = inlined_call_operand.vmem [shape: bf16[32,32], index: 6, kind: input, shape index: {}]   ;;  %s829_s3 = inlined_call_operand.vmem [shape: f32[1,32], index: 3, kind: input, shape index: {}]   ;;  %s830_s4 = inlined_call_operand.vmem [shape: f32[1,32], index: 4, kind: input, shape index: {}]   ;;  %s831_s0 = inlined_call_operand.vmem [shape: f32[16,32], index: 0, kind: input, shape index: {}]   ;;  %s832_s9 = inlined_call_operand.vmem [shape: bf16[32,32], index: 9, kind: input, shape index: {}]   ;;  %s833_s7 = inlined_call_operand.vmem [shape: f32[1,32], index: 7, kind: input, shape index: {}]   ;;  %s834_s8 = inlined_call_operand.vmem [shape: f32[1,32], index: 8, kind: input, shape index: {}]   ;;  %s835_s10 = inlined_call_operand.vmem [shape: f32[1,32], index: 10, kind: input, shape index: {}]   ;;  %s836_s11 = inlined_call_operand.vmem [shape: f32[1,32], index: 11, kind: input, shape index: {}]   ;;  %s837_s12 = inlined_call_operand.vmem [shape: f32[16,32], index: 12, kind: output, shape index: {}]  }
   0x1   :  { %155 = vmatprep.subr.bf16.mxu0 %v630_v0  ;;  %v597_v1 = vld [vmem:[%s825_s2] sm:$0xff]   ;;  %v598_v2 = vld [vmem:[%s825_s2 + $0x8] sm:$0xff]   ;;  %v599_v3 = vld [vmem:[%s825_s2 + $0x10] sm:$0xff]   ;;  %566 = vmatprep.subr.bf16.mxu1 %v631_v31  ;;  %vm632_vm2 = vmmov 0  }
   0x2   :  { %156 = vmatpush1.bf16.msra.mxu0 %v597_v1  ;;  %v600_v4 = vld [vmem:[%s825_s2 + $0x18] sm:$0xff]   ;;  %v611_v5 = vld [vmem:[%s826_s1 + $0x4] ss:$8 sps:$4 sm:$0xff]   ;;  %v603_v8 = vld [vmem:[%s825_s2 + $0x30] sm:$0xff]   ;;  %570 = vmatprep.mubr.msk.bf16.mxu1 %vm632_vm2, %v631_v31 }
   0x3   :  { %157 = vmatprep.subr.bf16.mxu0 %v630_v0  ;;  %v601_v6 = vld [vmem:[%s825_s2 + $0x20] sm:$0xff]   ;;  %541 = vmatprep.mubr.msk.bf16.mxu0 %vm151_vm0, %v611_v5  ;;  %v602_v7 = vld [vmem:[%s825_s2 + $0x28] sm:$0xff]   ;;  %v604_v9 = vld [vmem:[%s825_s2 + $0x38] sm:$0xff]  }
   0x4   :  { %v605_v10 = vld [vmem:[%s825_s2 + $0x40] sm:$0xff]   ;;  %v606_v11 = vld [vmem:[%s825_s2 + $0x48] sm:$0xff]   ;;  %v607_v12 = vld [vmem:[%s825_s2 + $0x50] sm:$0xff]  }
   0x5   :  { %v608_v13 = vld [vmem:[%s825_s2 + $0x58] sm:$0xff]   ;;  %v609_v14 = vld [vmem:[%s826_s1] ss:$8 sps:$4 sm:$0xff]  }
   0x6   :  { %158 = vmatpush1.bf16.msra.mxu0 %v598_v2  ;;  %v612_v32 = vld [vmem:[%s827_s5] sm:$0xff]   ;;  %v613_v33 = vld [vmem:[%s827_s5 + $0x8] sm:$0xff]  }
   0x7   :  { %159 = vmatprep.subr.bf16.mxu0 %v630_v0  ;;  %567 = vmatpush3.bf16.msra.mxu1 %v612_v32  ;;  %v542_v41 = vld [vmem:[%s829_s3] ss:$0 sm:$0xff]  ;;  %v615_v54 = vld [vmem:[%s828_s6 + $0x8] sm:$0xff]  }
   0x8   :  { %568 = vmatprep.subr.bf16.mxu1 %v631_v31  ;;  %v543_v45 = vld [vmem:[%s830_s4] ss:$0 sm:$0xff]  ;;  %v779_v56 = vld [vmem:[%s831_s0 + $0x8] sm:$0xff] }
   0x9   :  { %v614_v52 = vld [vmem:[%s828_s6] sm:$0xff]  }
   0xa   :  { %160 = vmatpush1.bf16.msra.mxu0 %v599_v3  ;;  %v774_v55 = vld [vmem:[%s831_s0] sm:$0xff] }
   0xb   :  { %161 = vmatprep.subr.bf16.mxu0 %v630_v0  ;;  %569 = vmatpush3.bf16.msra.mxu1 %v613_v33  ;;  %v305_v57 = vpack.c.bf16 %v779_v56, %v774_v55 }
   0xc   :  { %574 = vmatprep.subr.bf16.mxu1 %v631_v31 }
   0xe   :  { %162 = vmatpush1.bf16.msra.mxu0 %v600_v4 }
   0xf   :  { %163 = vmatprep.subr.bf16.mxu0 %v630_v0 }
  0x12   :  { %164 = vmatpush1.bf16.msra.mxu0 %v601_v6 }
  0x13   :  { %165 = vmatprep.subr.bf16.mxu0 %v630_v0 }
  0x16   :  { %166 = vmatpush1.bf16.msra.mxu0 %v602_v7 }
  0x17   :  { %167 = vmatprep.subr.bf16.mxu0 %v630_v0 }
  0x1a   :  { %168 = vmatpush1.bf16.msra.mxu0 %v603_v8 }
  0x1b   :  { %169 = vmatprep.subr.bf16.mxu0 %v630_v0 }
  0x1e   :  { %170 = vmatpush1.bf16.msra.mxu0 %v604_v9 }
  0x1f   :  { %171 = vmatprep.subr.bf16.mxu0 %v630_v0 }
  0x22   :  { %172 = vmatpush1.bf16.msra.mxu0 %v605_v10  ;;  %v616_v10 = vld [vmem:[%s832_s9] sm:$0xff]  }
  0x23   :  { %173 = vmatprep.subr.bf16.mxu0 %v630_v0 }
  0x26   :  { %174 = vmatpush1.bf16.msra.mxu0 %v606_v11  ;;  %v617_v11 = vld [vmem:[%s832_s9 + $0x8] sm:$0xff]  }
  0x27   :  { %175 = vmatprep.subr.bf16.mxu0 %v630_v0 }
  0x2a   :  { %176 = vmatpush1.bf16.msra.mxu0 %v607_v12 }
  0x2b   :  { %177 = vmatprep.subr.bf16.mxu0 %v630_v0 }
  0x2e   :  { %178 = vmatpush1.bf16.msra.mxu0 %v608_v13 }
  0x31   :  { %188 = vmatmul.mubr.bf16.vlgmr.msra.gmra.mrb[0].mxu0 %v609_v14 }
 0x104   :  { %v189_v15 = vpop.f32.mrb[0].mxu0 }
 0x105   :  { %v191_v16 = vpop.f32.mrb[1].mxu0  ;;  %v199_v17 = vsel %vm198_vm1, %v189_v15, 0.0 }
 0x106   :  { %200 = vadd.xlane.f32.xlu0 %v199_v17  ;;  %v192_v18 = vpop.f32.mrb[2].mxu0 }
 0x107   :  { %v194_v19 = vpop.f32.mrb[3].mxu0  ;;  %v202_v20 = vsel %vm198_vm1, %v192_v18, 0.0 }
 0x108   :  { %v550_v19 = vld [vmem:[%s833_s7] ss:$0 sm:$0xff] }
 0x10a   :  { %203 = vadd.xlane.f32.xlu0 %v202_v20 }
 0x193   :  { %v201_v21 = vpop.xlane.xlu0 %200 }
 0x194   :  { %v206_v22 = vmul.f32 0.03125, %v201_v21 }
 0x196   :  { %v208_v23 = vsub.f32 %v189_v15, %v206_v22  ;;  %v551_v22 = vld [vmem:[%s834_s8] ss:$0 sm:$0xff] }
 0x197   :  { %v204_v24 = vpop.xlane.xlu0 %203 }
 0x198   :  { %v207_v25 = vmul.f32 0.03125, %v204_v24  ;;  %v210_v26 = vmul.f32 %v208_v23, %v208_v23 }
 0x19a   :  { %v209_v27 = vsub.f32 %v192_v18, %v207_v25  ;;  %v212_v28 = vsel %vm198_vm1, %v210_v26, 0.0 }
 0x19b   :  { %213 = vadd.xlane.f32.xlu1 %v212_v28 }
 0x19c   :  { %v211_v29 = vmul.f32 %v209_v27, %v209_v27 }
 0x19e   :  { %v215_v30 = vsel %vm198_vm1, %v211_v29, 0.0 }
 0x19f   :  { %216 = vadd.xlane.f32.xlu1 %v215_v30 }
 0x228   :  { %v214_v34 = vpop.xlane.xlu1 %213 }
 0x229   :  { %v218_v35 = vmul.f32 0.03125, %v214_v34 }
 0x22b   :  { %v220_v36 = vadd.f32 1e-05, %v218_v35 }
 0x22c   :  { %v217_v37 = vpop.xlane.xlu1 %216 }
 0x22d   :  { %618 = vrsqrt.f32 %v220_v36  ;;  %v219_v38 = vmul.f32 0.03125, %v217_v37 }
 0x22f   :  { %v221_v39 = vadd.f32 1e-05, %v219_v38 }
 0x231   :  { %620 = vrsqrt.f32 %v221_v39 }
 0x237   :  { %v619_v40 = vpop.eup %618 }
 0x238   :  { %v224_v42 = vmul.f32 %v619_v40, %v208_v23 }
 0x23a   :  { %v232_v43 = vmul.f32 %v542_v41, %v224_v42 }
 0x23b   :  { %v621_v44 = vpop.eup %620 }
 0x23c   :  { %v225_v46 = vmul.f32 %v621_v44, %v209_v27  ;;  %v240_v48 = vadd.f32 %v543_v45, %v232_v43 }
 0x23e   :  { %v233_v47 = vmul.f32 %v542_v41, %v225_v46  ;;  %v242_v50 = vmax.f32 %v240_v48, 0.0 }
 0x240   :  { %v241_v49 = vadd.f32 %v543_v45, %v233_v47 }
 0x242   :  { %v243_v51 = vmax.f32 %v241_v49, 0.0 }
 0x244   :  { %v244_v53 = vpack.c.bf16 %v243_v51, %v242_v50 }
 0x246   :  { %571 = vmatmul.mubr.msk.bf16.vlgmr.msra.gmra.mrb[0].mxu1 %vm198_vm1, %v244_v53 }
 0x247   :  { %575 = vmatpush3.bf16.msra.mxu1 %v614_v52  ;;  %578 = vmatprep.mubr.msk.bf16.mxu1 %vm632_vm2, %v631_v31 }
 0x248   :  { %576 = vmatprep.subr.bf16.mxu1 %v631_v31 }
 0x24b   :  { %577 = vmatpush3.bf16.msra.mxu1 %v615_v54  ;;  %v555_v54 = vld [vmem:[%s835_s10] ss:$0 sm:$0xff] }
 0x24c   :  { %582 = vmatprep.subr.bf16.mxu1 %v631_v31 }
 0x252   :  { %579 = vmatmul.mubr.msk.bf16.vlgmr.msra.gmra.mrb[0].mxu1 %vm198_vm1, %v305_v57 }
 0x253   :  { %586 = vmatprep.mubr.msk.bf16.mxu1 %vm632_vm2, %v631_v31  ;;  %583 = vmatpush3.bf16.msra.mxu1 %v616_v10 }
 0x254   :  { %584 = vmatprep.subr.bf16.mxu1 %v631_v31 }
 0x257   :  { %585 = vmatpush3.bf16.msra.mxu1 %v617_v11 }
 0x325   :  { %v359_v58 = vpop.f32.mrb[0].mxu1 }
 0x326   :  { %v580_v59 = vpop.f32.mrb[1].mxu1  ;;  %v368_v60 = vsel %vm198_vm1, %v359_v58, 0.0 }
 0x327   :  { %369 = vadd.xlane.f32.xlu0 %v368_v60  ;;  %v362_v61 = vpop.f32.mrb[2].mxu1  ;;  %v556_v59 = vld [vmem:[%s836_s11] ss:$0 sm:$0xff] }
 0x328   :  { %v581_v62 = vpop.f32.mrb[3].mxu1  ;;  %v371_v63 = vsel %vm198_vm1, %v362_v61, 0.0 }
 0x329   :  { %372 = vadd.xlane.f32.xlu1 %v371_v63 }
 0x3b4   :  { %v370_v0 = vpop.xlane.xlu0 %369 }
 0x3b5   :  { %v374_v1 = vmul.f32 0.03125, %v370_v0 }
 0x3b6   :  { %v373_v2 = vpop.xlane.xlu1 %372 }
 0x3b7   :  { %v376_v3 = vsub.f32 %v359_v58, %v374_v1  ;;  %v375_v4 = vmul.f32 0.03125, %v373_v2 }
 0x3b9   :  { %v377_v5 = vsub.f32 %v362_v61, %v375_v4  ;;  %v378_v6 = vmul.f32 %v376_v3, %v376_v3 }
 0x3bb   :  { %v380_v7 = vsel %vm198_vm1, %v378_v6, 0.0  ;;  %v379_v8 = vmul.f32 %v377_v5, %v377_v5 }
 0x3bc   :  { %381 = vadd.xlane.f32.xlu0 %v380_v7 }
 0x3bd   :  { %v383_v9 = vsel %vm198_vm1, %v379_v8, 0.0 }
 0x3be   :  { %384 = vadd.xlane.f32.xlu1 %v383_v9 }
 0x449   :  { %v382_v12 = vpop.xlane.xlu0 %381 }
 0x44a   :  { %v386_v13 = vmul.f32 0.03125, %v382_v12 }
 0x44b   :  { %v385_v14 = vpop.xlane.xlu1 %384 }
 0x44c   :  { %v388_v15 = vadd.f32 1e-05, %v386_v13  ;;  %v387_v16 = vmul.f32 0.03125, %v385_v14 }
 0x44e   :  { %622 = vrsqrt.f32 %v388_v15  ;;  %v389_v17 = vadd.f32 1e-05, %v387_v16 }
 0x450   :  { %624 = vrsqrt.f32 %v389_v17 }
 0x458   :  { %v623_v18 = vpop.eup %622 }
 0x459   :  { %v392_v20 = vmul.f32 %v623_v18, %v376_v3 }
 0x45a   :  { %v625_v21 = vpop.eup %624 }
 0x45b   :  { %v400_v23 = vmul.f32 %v550_v19, %v392_v20  ;;  %v393_v24 = vmul.f32 %v625_v21, %v377_v5 }
 0x45d   :  { %v401_v25 = vmul.f32 %v550_v19, %v393_v24  ;;  %v408_v26 = vadd.f32 %v551_v22, %v400_v23 }
 0x45f   :  { %v409_v27 = vadd.f32 %v551_v22, %v401_v25  ;;  %v410_v28 = vmax.f32 %v408_v26, 0.0 }
 0x461   :  { %v411_v29 = vmax.f32 %v409_v27, 0.0 }
 0x463   :  { %v412_v30 = vpack.c.bf16 %v411_v29, %v410_v28 }
 0x465   :  { %587 = vmatmul.mubr.msk.bf16.vlgmr.msra.gmra.mrb[4].mxu1 %vm198_vm1, %v412_v30 }
 0x538   :  { %v466_v31 = vpop.f32.mrb[4].mxu1 }
 0x539   :  { %v588_v32 = vpop.f32.mrb[5].mxu1  ;;  %v475_v33 = vsel %vm198_vm1, %v466_v31, 0.0 }
 0x53a   :  { %476 = vadd.xlane.f32.xlu0 %v475_v33  ;;  %v469_v34 = vpop.f32.mrb[6].mxu1 }
 0x53b   :  { %v589_v35 = vpop.f32.mrb[7].mxu1  ;;  %v478_v36 = vsel %vm198_vm1, %v469_v34, 0.0 }
 0x53c   :  { %479 = vadd.xlane.f32.xlu1 %v478_v36 }
 0x5c7   :  { %v477_v37 = vpop.xlane.xlu0 %476 }
 0x5c8   :  { %v481_v38 = vmul.f32 0.03125, %v477_v37 }
 0x5c9   :  { %v480_v39 = vpop.xlane.xlu1 %479 }
 0x5ca   :  { %v483_v40 = vsub.f32 %v466_v31, %v481_v38  ;;  %v482_v41 = vmul.f32 0.03125, %v480_v39 }
 0x5cc   :  { %v484_v42 = vsub.f32 %v469_v34, %v482_v41  ;;  %v485_v43 = vmul.f32 %v483_v40, %v483_v40 }
 0x5ce   :  { %v487_v44 = vsel %vm198_vm1, %v485_v43, 0.0  ;;  %v486_v45 = vmul.f32 %v484_v42, %v484_v42 }
 0x5cf   :  { %488 = vadd.xlane.f32.xlu0 %v487_v44 }
 0x5d0   :  { %v490_v46 = vsel %vm198_vm1, %v486_v45, 0.0 }
 0x5d1   :  { %491 = vadd.xlane.f32.xlu1 %v490_v46 }
 0x65c   :  { %v489_v47 = vpop.xlane.xlu0 %488 }
 0x65d   :  { %v493_v48 = vmul.f32 0.03125, %v489_v47 }
 0x65e   :  { %v492_v49 = vpop.xlane.xlu1 %491 }
 0x65f   :  { %v495_v50 = vadd.f32 1e-05, %v493_v48  ;;  %v494_v51 = vmul.f32 0.03125, %v492_v49 }
 0x661   :  { %626 = vrsqrt.f32 %v495_v50  ;;  %v496_v52 = vadd.f32 1e-05, %v494_v51 }
 0x663   :  { %628 = vrsqrt.f32 %v496_v52 }
 0x66b   :  { %v627_v53 = vpop.eup %626 }
 0x66c   :  { %v499_v57 = vmul.f32 %v627_v53, %v483_v40 }
 0x66d   :  { %v629_v58 = vpop.eup %628 }
 0x66e   :  { %v507_v60 = vmul.f32 %v555_v54, %v499_v57  ;;  %v500_v61 = vmul.f32 %v629_v58, %v484_v42 }
 0x670   :  { %v515_v62 = vadd.f32 %v556_v59, %v507_v60  ;;  %v508_v63 = vmul.f32 %v555_v54, %v500_v61 }
 0x672   :  { %v517_v0 = vadd.f32 %v515_v62, %v774_v55  ;;  %v516_v1 = vadd.f32 %v556_v59, %v508_v63 }
 0x674   :  { %v519_v2 = vmax.f32 %v517_v0, 0.0  ;;  %v518_v3 = vadd.f32 %v516_v1, %v779_v56 }
 0x676   :  { %521 = vst.msk [vmem:[%s837_s12] sm:$0xff] %vm198_vm1, %v519_v2  ;;  %v520_v4 = vmax.f32 %v518_v3, 0.0 }
 0x678   :  { %522 = vst.msk [vmem:[%s837_s12 + $0x8] sm:$0xff] %vm198_vm1, %v520_v4 }

// kernel: _att_hot.2
= control target key start
LH: loop header
LB: loop body
LE: loop exit
PB: predicated region body
PF: predicated region fallthrough
CT: control target
= control target key end

     0   :  { %v1721_v1 = vmov 0   ;;  %vm105_vm0 = vcmask 261120   ;;  %vm193_vm1 = vcmask 523264   ;;  %s2759_s3 = inlined_call_operand.vmem [shape: bf16[32,192], index: 3, kind: input, shape index: {}]   ;;  %s2760_s6 = inlined_call_operand.vmem [shape: bf16[32,192], index: 6, kind: input, shape index: {}]   ;;  %s2761_s0 = inlined_call_operand.vmem [shape: bf16[64,32], index: 0, kind: input, shape index: {}]   ;;  %s2762_s1 = inlined_call_operand.vmem [shape: bf16[64,32], index: 1, kind: input, shape index: {}]   ;;  %s2763_s9 = inlined_call_operand.vmem [shape: bf16[32,192], index: 9, kind: input, shape index: {}]   ;;  %s2764_s12 = inlined_call_operand.vmem [shape: bf16[192,192], index: 12, kind: input, shape index: {}]   ;;  %s2765_s4 = inlined_call_operand.vmem [shape: f32[1,192], index: 4, kind: input, shape index: {}]   ;;  %s2766_s5 = inlined_call_operand.vmem [shape: f32[1,192], index: 5, kind: input, shape index: {}]   ;;  %s2767_s7 = inlined_call_operand.vmem [shape: f32[1,192], index: 7, kind: input, shape index: {}]   ;;  %s2768_s8 = inlined_call_operand.vmem [shape: f32[1,192], index: 8, kind: input, shape index: {}]   ;;  %s2769_s2 = inlined_call_operand.vmem [shape: f32[64,1], index: 2, kind: input, shape index: {}]   ;;  %s2770_s10 = inlined_call_operand.vmem [shape: f32[1,192], index: 10, kind: input, shape index: {}]   ;;  %s2771_s11 = inlined_call_operand.vmem [shape: f32[1,192], index: 11, kind: input, shape index: {}]   ;;  %s2772_s13 = inlined_call_operand.vmem [shape: f32[64,192], index: 13, kind: output, shape index: {}]  }
   0x1   :  { %v1547_v0 = vld [vmem:[%s2759_s3 + $0x4] ss:$8 sps:$4 sm:$0xff]   ;;  %150 = vmatprep.mubr.bf16.mxu0 %v1721_v1  ;;  %497 = vmatprep.mubr.bf16.mxu1 %v1721_v1  ;;  %v1551_v3 = vld [vmem:[%s2759_s3] ss:$8 sps:$4 sm:$0xff]   ;;  %v1553_v5 = vld [vmem:[%s2759_s3 + $0x14] ss:$8 sps:$4 sm:$0xff]  }
   0x2   :  { %v1549_v2 = vld [vmem:[%s2760_s6 + $0x4] ss:$8 sps:$4 sm:$0xff]   ;;  %1546 = vset.pattern.permute.xlu1 %v1721_v1  ;;  %1545 = vset.pattern.permute.xlu0 %v1721_v1  ;;  %v1552_v4 = vld [vmem:[%s2760_s6] ss:$8 sps:$4 sm:$0xff]   ;;  %v1555_v6 = vld [vmem:[%s2760_s6 + $0x14] ss:$8 sps:$4 sm:$0xff]  }
   0x3   :  { %118 = vmatprep.subr.bf16.mxu0 %v1547_v0  ;;  %465 = vmatprep.subr.bf16.mxu1 %v1549_v2  ;;  %v1557_v7 = vld [vmem:[%s2759_s3 + $0x10] ss:$8 sps:$4 sm:$0xff]   ;;  %v1559_v9 = vld [vmem:[%s2761_s0] sm:$0xff]   ;;  %v1561_v11 = vld [vmem:[%s2761_s0 + $0x8] sm:$0xff]  }
   0x4   :  { %119 = vmatpush1.bf16.msra.mxu0 %v1551_v3  ;;  %466 = vmatpush1.bf16.msra.mxu1 %v1552_v4  ;;  %v1558_v8 = vld [vmem:[%s2760_s6 + $0x10] ss:$8 sps:$4 sm:$0xff]   ;;  %v1560_v10 = vld [vmem:[%s2762_s1] sm:$0xff]   ;;  %v1562_v14 = vld [vmem:[%s2762_s1 + $0x8] sm:$0xff]  }
   0x5   :  { %120 = vmatprep.subr.bf16.mxu0 %v1553_v5  ;;  %467 = vmatprep.subr.bf16.mxu1 %v1555_v6  ;;  %v1567_v12 = vld [vmem:[%s2763_s9] ss:$8 sps:$4 sm:$0xff]   ;;  %v1569_v13 = vld [vmem:[%s2763_s9 + $0x4] ss:$8 sps:$4 sm:$0xff]   ;;  %v1572_v15 = vld [vmem:[%s2763_s9 + $0x14] ss:$8 sps:$4 sm:$0xff]  }
   0x6   :  { %v1570_v16 = vld [vmem:[%s2763_s9 + $0x10] ss:$8 sps:$4 sm:$0xff]  }
   0x7   :  { %v1563_v17 = vld [vmem:[%s2761_s0 + $0x10] sm:$0xff]   ;;  %v1565_v19 = vld [vmem:[%s2761_s0 + $0x18] sm:$0xff]  }
   0x8   :  { %121 = vmatpush1.bf16.msra.mxu0 %v1557_v7  ;;  %468 = vmatpush1.bf16.msra.mxu1 %v1558_v8  ;;  %v1564_v18 = vld [vmem:[%s2762_s1 + $0x10] sm:$0xff]   ;;  %v1566_v20 = vld [vmem:[%s2762_s1 + $0x18] sm:$0xff]  }
   0x9   :  { %778 = vmatprep.subr.bf16.mxu0 %v1569_v13 }
   0xb   :  { %1492 = vmatmul.mubr.msk.bf16.vlgmr.msra.gmra.mrb[0].mxu0 %vm105_vm0, %v1559_v9  ;;  %1504 = vmatmul.mubr.msk.bf16.vlgmr.msra.gmra.mrb[0].mxu1 %vm105_vm0, %v1560_v10 }
   0xc   :  { %160 = vmatprep.mubr.bf16.mxu0 %v1721_v1  ;;  %507 = vmatprep.mubr.bf16.mxu1 %v1721_v1 }
   0xd   :  { %779 = vmatpush1.bf16.msra.mxu0 %v1567_v12 }
   0xe   :  { %780 = vmatprep.subr.bf16.mxu0 %v1572_v15 }
  0x11   :  { %781 = vmatpush1.bf16.msra.mxu0 %v1570_v16 }
  0x13   :  { %1493 = vmatmul.mubr.msk.bf16.gmra.mrb[4].mxu0 %vm105_vm0, %v1561_v11  ;;  %1505 = vmatmul.mubr.msk.bf16.gmra.mrb[4].mxu1 %vm105_vm0, %v1562_v14 }
  0x14   :  { %170 = vmatprep.mubr.bf16.mxu0 %v1721_v1  ;;  %517 = vmatprep.mubr.bf16.mxu1 %v1721_v1 }
  0x1b   :  { %1494 = vmatmul.mubr.msk.bf16.gmra.mrb[8].mxu0 %vm105_vm0, %v1563_v17  ;;  %1506 = vmatmul.mubr.msk.bf16.gmra.mrb[8].mxu1 %vm105_vm0, %v1564_v18 }
  0x1c   :  { %180 = vmatprep.mubr.bf16.mxu0 %v1721_v1  ;;  %527 = vmatprep.mubr.bf16.mxu1 %v1721_v1 }
  0x23   :  { %1495 = vmatmul.mubr.msk.bf16.gmra.mrb[12].mxu0 %vm105_vm0, %v1565_v19  ;;  %1507 = vmatmul.mubr.msk.bf16.gmra.mrb[12].mxu1 %vm105_vm0, %v1566_v20 }
  0x24   :  { %810 = vmatprep.mubr.bf16.mxu0 %v1721_v1 }
  0x2b   :  { %1512 = vmatmul.mubr.msk.bf16.vlgmr.msra.gmra.mrb[16].mxu0 %vm105_vm0, %v1560_v10 }
  0x2c   :  { %820 = vmatprep.mubr.bf16.mxu0 %v1721_v1 }
  0x33   :  { %1513 = vmatmul.mubr.msk.bf16.gmra.mrb[20].mxu0 %vm105_vm0, %v1562_v14 }
  0x34   :  { %830 = vmatprep.mubr.bf16.mxu0 %v1721_v1 }
  0x3b   :  { %1514 = vmatmul.mubr.msk.bf16.gmra.mrb[24].mxu0 %vm105_vm0, %v1564_v18 }
  0x3c   :  { %840 = vmatprep.mubr.bf16.mxu0 %v1721_v1 }
  0x43   :  { %1515 = vmatmul.mubr.msk.bf16.gmra.mrb[28].mxu0 %vm105_vm0, %v1566_v20 }
  0xde   :  { %v1864_v21 = vpop.f32.mrb[0].mxu0  ;;  %v1866_v22 = vpop.f32.mrb[0].mxu1 }
  0xdf   :  { %v1868_v23 = vpop.f32.mrb[1].mxu0  ;;  %v1870_v24 = vpop.f32.mrb[1].mxu1 }
  0xe0   :  { %v1872_v25 = vpop.f32.mrb[2].mxu0  ;;  %v1874_v26 = vpop.f32.mrb[2].mxu1  ;;  %v540_v27 = vsel %vm193_vm1, %v1870_v24, 0.0  ;;  %v194_v28 = vsel %vm193_vm1, %v1868_v23, 0.0 }
  0xe1   :  { %v1880_v29 = vpop.f32.mrb[3].mxu0  ;;  %v1882_v30 = vpop.f32.mrb[3].mxu1  ;;  %v541_v31 = vadd.f32 %v540_v27, %v1866_v22  ;;  %v195_v32 = vadd.f32 %v194_v28, %v1864_v21 }
  0xe2   :  { %v198_v33 = vsel %vm193_vm1, %v1880_v29, 0.0  ;;  %v544_v34 = vsel %vm193_vm1, %v1882_v30, 0.0 }
  0xe3   :  { %542 = vadd.xlane.f32.xlu1 %v541_v31  ;;  %196 = vadd.xlane.f32.xlu0 %v195_v32  ;;  %v545_v35 = vadd.f32 %v544_v34, %v1874_v26  ;;  %v199_v36 = vadd.f32 %v198_v33, %v1872_v25 }
  0xe6   :  { %v1892_v37 = vpop.f32.mrb[4].mxu0  ;;  %v1894_v38 = vpop.f32.mrb[4].mxu1 }
  0xe7   :  { %546 = vadd.xlane.f32.xlu1 %v545_v35  ;;  %200 = vadd.xlane.f32.xlu0 %v199_v36  ;;  %v1896_v39 = vpop.f32.mrb[5].mxu0  ;;  %v1898_v40 = vpop.f32.mrb[5].mxu1 }
  0xe8   :  { %v202_v41 = vsel %vm193_vm1, %v1896_v39, 0.0  ;;  %v1902_v42 = vpop.f32.mrb[6].mxu0  ;;  %v548_v43 = vsel %vm193_vm1, %v1898_v40, 0.0  ;;  %v1906_v44 = vpop.f32.mrb[6].mxu1 }
  0xe9   :  { %v1908_v45 = vpop.f32.mrb[7].mxu0  ;;  %v1910_v46 = vpop.f32.mrb[7].mxu1  ;;  %v203_v47 = vadd.f32 %v202_v41, %v1892_v37  ;;  %v549_v48 = vadd.f32 %v548_v43, %v1894_v38 }
  0xea   :  { %v206_v49 = vsel %vm193_vm1, %v1908_v45, 0.0  ;;  %v552_v50 = vsel %vm193_vm1, %v1910_v46, 0.0 }
  0xeb   :  { %204 = vadd.xlane.f32.xlu0 %v203_v47  ;;  %v207_v51 = vadd.f32 %v206_v49, %v1902_v42  ;;  %v553_v52 = vadd.f32 %v552_v50, %v1906_v44 }
  0xed   :  { %208 = vadd.xlane.f32.xlu1 %v207_v51 }
  0xee   :  { %v1920_v53 = vpop.f32.mrb[8].mxu0  ;;  %v1922_v54 = vpop.f32.mrb[8].mxu1 }
  0xef   :  { %550 = vadd.xlane.f32.xlu0 %v549_v48  ;;  %v1924_v55 = vpop.f32.mrb[9].mxu0  ;;  %v1926_v56 = vpop.f32.mrb[9].mxu1 }
  0xf0   :  { %v210_v57 = vsel %vm193_vm1, %v1924_v55, 0.0  ;;  %v1930_v58 = vpop.f32.mrb[10].mxu0  ;;  %v556_v59 = vsel %vm193_vm1, %v1926_v56, 0.0  ;;  %v1934_v60 = vpop.f32.mrb[10].mxu1 }
  0xf1   :  { %554 = vadd.xlane.f32.xlu1 %v553_v52  ;;  %v1936_v61 = vpop.f32.mrb[11].mxu0  ;;  %v1938_v62 = vpop.f32.mrb[11].mxu1  ;;  %v211_v63 = vadd.f32 %v210_v57, %v1920_v53  ;;  %v557_v0 = vadd.f32 %v556_v59, %v1922_v54 }
  0xf2   :  { %v214_v1 = vsel %vm193_vm1, %v1936_v61, 0.0  ;;  %v560_v2 = vsel %vm193_vm1, %v1938_v62, 0.0 }
  0xf3   :  { %212 = vadd.xlane.f32.xlu0 %v211_v63  ;;  %v215_v3 = vadd.f32 %v214_v1, %v1930_v58  ;;  %v561_v4 = vadd.f32 %v560_v2, %v1934_v60 }
  0xf5   :  { %216 = vadd.xlane.f32.xlu1 %v215_v3 }
  0xf6   :  { %v1948_v5 = vpop.f32.mrb[12].mxu0  ;;  %v1950_v6 = vpop.f32.mrb[12].mxu1 }
  0xf7   :  { %558 = vadd.xlane.f32.xlu0 %v557_v0  ;;  %v1952_v7 = vpop.f32.mrb[13].mxu0  ;;  %v1954_v8 = vpop.f32.mrb[13].mxu1 }
  0xf8   :  { %v218_v9 = vsel %vm193_vm1, %v1952_v7, 0.0  ;;  %v1958_v10 = vpop.f32.mrb[14].mxu0  ;;  %v564_v11 = vsel %vm193_vm1, %v1954_v8, 0.0  ;;  %v1962_v12 = vpop.f32.mrb[14].mxu1 }
  0xf9   :  { %562 = vadd.xlane.f32.xlu1 %v561_v4  ;;  %v1964_v13 = vpop.f32.mrb[15].mxu0  ;;  %v1966_v14 = vpop.f32.mrb[15].mxu1  ;;  %v219_v15 = vadd.f32 %v218_v9, %v1948_v5  ;;  %v565_v16 = vadd.f32 %v564_v11, %v1950_v6 }
  0xfa   :  { %v222_v17 = vsel %vm193_vm1, %v1964_v13, 0.0  ;;  %v568_v18 = vsel %vm193_vm1, %v1966_v14, 0.0 }
  0xfb   :  { %220 = vadd.xlane.f32.xlu0 %v219_v15  ;;  %v223_v19 = vadd.f32 %v222_v17, %v1958_v10  ;;  %v569_v20 = vadd.f32 %v568_v18, %v1962_v12 }
  0xfd   :  { %224 = vadd.xlane.f32.xlu1 %v223_v19 }
  0xfe   :  { %v1976_v27 = vpop.f32.mrb[16].mxu0 }
  0xff   :  { %566 = vadd.xlane.f32.xlu0 %v565_v16  ;;  %v1978_v28 = vpop.f32.mrb[17].mxu0 }
 0x100   :  { %v853_v31 = vsel %vm193_vm1, %v1978_v28, 0.0  ;;  %v1982_v32 = vpop.f32.mrb[18].mxu0 }
 0x101   :  { %570 = vadd.xlane.f32.xlu1 %v569_v20  ;;  %v1984_v33 = vpop.f32.mrb[19].mxu0  ;;  %v1989_v35 = vadd.f32 %v853_v31, %v1976_v27  ;;  %v1573_v31 = vld [vmem:[%s2764_s12] ss:$8 sps:$4 sm:$0xff]  }
 0x102   :  { %v857_v34 = vsel %vm193_vm1, %v1984_v33, 0.0 }
 0x103   :  { %v1992_v36 = vadd.f32 %v857_v34, %v1982_v32  ;;  %v1575_v34 = vld [vmem:[%s2764_s12 + $0x4] ss:$8 sps:$4 sm:$0xff]  }
 0x104   :  { %1295 = vmatprep.subr.bf16.mxu1 %v1575_v34 }
 0x105   :  { %1296 = vmatpush1.bf16.msra.mxu1 %v1573_v31 }
 0x106   :  { %v1994_v41 = vpop.f32.mrb[20].mxu0 }
 0x107   :  { %v1996_v43 = vpop.f32.mrb[21].mxu0 }
 0x108   :  { %v861_v47 = vsel %vm193_vm1, %v1996_v43, 0.0  ;;  %v2000_v48 = vpop.f32.mrb[22].mxu0 }
 0x109   :  { %2790 = vst [vmem:[#allocation2_spill] sm:$0xff] %v2000_v48  ;;  %v2002_v49 = vpop.f32.mrb[23].mxu0  ;;  %v2009_v52 = vadd.f32 %v861_v47, %v1994_v41  ;;  %v1578_v47 = vld [vmem:[%s2764_s12 + $0x14] ss:$8 sps:$4 sm:$0xff]  }
 0x10a   :  { %2791 = vst [vmem:[#allocation3_spill] sm:$0xff] %v2002_v49  ;;  %v865_v50 = vsel %vm193_vm1, %v2002_v49, 0.0  ;;  %1297 = vmatprep.subr.bf16.mxu1 %v1578_v47 }
 0x10b   :  { %v2012_v57 = vadd.f32 %v865_v50, %v2000_v48  ;;  %v1576_v50 = vld [vmem:[%s2764_s12 + $0x10] ss:$8 sps:$4 sm:$0xff]  }
 0x10c   :  { %1298 = vmatpush1.bf16.msra.mxu1 %v1576_v50 }
 0x10e   :  { %v2006_v51 = vpop.f32.mrb[24].mxu0 }
 0x10f   :  { %2792 = vst [vmem:[#allocation4_spill] sm:$0xff] %v2006_v51  ;;  %v2014_v59 = vpop.f32.mrb[25].mxu0 }
 0x110   :  { %2793 = vst [vmem:[#allocation5_spill] sm:$0xff] %v2014_v59  ;;  %v869_v63 = vsel %vm193_vm1, %v2014_v59, 0.0  ;;  %v2018_v0 = vpop.f32.mrb[26].mxu0 }
 0x111   :  { %2794 = vst [vmem:[#allocation6_spill] sm:$0xff] %v2018_v0  ;;  %v2020_v1 = vpop.f32.mrb[27].mxu0  ;;  %v2023_v2 = vadd.f32 %v869_v63, %v2006_v51  ;;  %v1581_v63 = vld [vmem:[%s2764_s12 + $0x24] ss:$8 sps:$4 sm:$0xff]  }
 0x112   :  { %2795 = vst [vmem:[#allocation7_spill] sm:$0xff] %v2020_v1  ;;  %v873_v3 = vsel %vm193_vm1, %v2020_v1, 0.0  ;;  %1299 = vmatprep.subr.bf16.mxu1 %v1581_v63 }
 0x113   :  { %v2039_v17 = vadd.f32 %v873_v3, %v2018_v0  ;;  %v1579_v3 = vld [vmem:[%s2764_s12 + $0x20] ss:$8 sps:$4 sm:$0xff]  }
 0x114   :  { %1300 = vmatpush1.bf16.msra.mxu1 %v1579_v3 }
 0x116   :  { %v2027_v4 = vpop.f32.mrb[28].mxu0 }
 0x117   :  { %2796 = vst [vmem:[#allocation8_spill] sm:$0xff] %v2027_v4  ;;  %v2029_v9 = vpop.f32.mrb[29].mxu0 }
 0x118   :  { %2797 = vst [vmem:[#allocation9_spill] sm:$0xff] %v2029_v9  ;;  %v877_v11 = vsel %vm193_vm1, %v2029_v9, 0.0  ;;  %v2033_v15 = vpop.f32.mrb[30].mxu0 }
 0x119   :  { %2798 = vst [vmem:[#allocation10_spill] sm:$0xff] %v2033_v15  ;;  %v2036_v16 = vadd.f32 %v877_v11, %v2027_v4  ;;  %v2041_v18 = vpop.f32.mrb[31].mxu0 }
 0x11a   :  { %2799 = vst [vmem:[#allocation11_spill] sm:$0xff] %v2041_v18  ;;  %v881_v19 = vsel %vm193_vm1, %v2041_v18, 0.0 }
 0x11b   :  { %v2046_v20 = vadd.f32 %v881_v19, %v2033_v15 }
 0x170   :  { %v543_v11 = vpop.xlane.xlu1 %542  ;;  %v197_v19 = vpop.xlane.xlu0 %196 }
 0x171   :  { %v572_v34 = vmul.f32 0.0052083335, %v543_v11  ;;  %v227_v15 = vmul.f32 0.0052083335, %v197_v19 }
 0x173   :  { %v2067_v18 = vsub.f32 %v1870_v24, %v572_v34  ;;  %v2070_v31 = vsub.f32 %v1864_v21, %v227_v15  ;;  %v2073_v1 = vsub.f32 %v1868_v23, %v227_v15  ;;  %v2076_v47 = vsub.f32 %v1866_v22, %v572_v34 }
 0x174   :  { %v547_v0 = vpop.xlane.xlu1 %546  ;;  %v201_v50 = vpop.xlane.xlu0 %200 }
 0x175   :  { %v573_v63 = vmul.f32 0.0052083335, %v547_v0  ;;  %v228_v3 = vmul.f32 0.0052083335, %v201_v50  ;;  %v251_v11 = vmul.f32 %v2070_v31, %v2070_v31  ;;  %v252_v24 = vmul.f32 %v2073_v1, %v2073_v1 }
 0x176   :  { %v597_v21 = vmul.f32 %v2067_v18, %v2067_v18  ;;  %v596_v50 = vmul.f32 %v2076_v47, %v2076_v47 }
 0x177   :  { %v2085_v19 = vsub.f32 %v1882_v30, %v573_v63  ;;  %v2088_v23 = vsub.f32 %v1872_v25, %v228_v3  ;;  %v2091_v22 = vsub.f32 %v1880_v29, %v228_v3  ;;  %v2094_v0 = vsub.f32 %v1874_v26, %v573_v63 }
 0x178   :  { %v205_v15 = vpop.xlane.xlu0 %204  ;;  %v267_v34 = vsel %vm193_vm1, %v252_v24, 0.0  ;;  %v612_v30 = vsel %vm193_vm1, %v597_v21, 0.0 }
 0x179   :  { %v229_v9 = vmul.f32 0.0052083335, %v205_v15  ;;  %v268_v4 = vadd.f32 %v267_v34, %v251_v11  ;;  %v253_v25 = vmul.f32 %v2088_v23, %v2088_v23  ;;  %v254_v29 = vmul.f32 %v2091_v22, %v2091_v22 }
 0x17a   :  { %v209_v49 = vpop.xlane.xlu1 %208  ;;  %v599_v26 = vmul.f32 %v2085_v19, %v2085_v19  ;;  %v613_v21 = vadd.f32 %v612_v30, %v596_v50  ;;  %v598_v34 = vmul.f32 %v2094_v0, %v2094_v0 }
 0x17b   :  { %v2107_v63 = vsub.f32 %v1892_v37, %v229_v9  ;;  %v2110_v3 = vsub.f32 %v1896_v39, %v229_v9  ;;  %v230_v24 = vmul.f32 0.0052083335, %v209_v49  ;;  %269 = vadd.xlane.f32.xlu0 %v268_v4  ;;  %v271_v15 = vsel %vm193_vm1, %v254_v29, 0.0 }
 0x17c   :  { %v551_v11 = vpop.xlane.xlu0 %550  ;;  %v616_v48 = vsel %vm193_vm1, %v599_v26, 0.0  ;;  %v272_v39 = vadd.f32 %v271_v15, %v253_v25 }
 0x17d   :  { %v2117_v59 = vsub.f32 %v1902_v42, %v230_v24  ;;  %v2120_v37 = vsub.f32 %v1908_v45, %v230_v24  ;;  %v574_v51 = vmul.f32 0.0052083335, %v551_v11  ;;  %v255_v49 = vmul.f32 %v2107_v63, %v2107_v63 }
 0x17e   :  { %v555_v9 = vpop.xlane.xlu1 %554  ;;  %v256_v4 = vmul.f32 %v2110_v3, %v2110_v3  ;;  %273 = vadd.xlane.f32.xlu1 %v272_v39  ;;  %v617_v25 = vadd.f32 %v616_v48, %v598_v34 }
 0x17f   :  { %v2127_v50 = vsub.f32 %v1894_v38, %v574_v51  ;;  %v2130_v30 = vsub.f32 %v1898_v40, %v574_v51  ;;  %v575_v42 = vmul.f32 0.0052083335, %v555_v9  ;;  %614 = vadd.xlane.f32.xlu0 %v613_v21  ;;  %v257_v26 = vmul.f32 %v2117_v59, %v2117_v59 }
 0x180   :  { %v213_v45 = vpop.xlane.xlu0 %212  ;;  %v275_v29 = vsel %vm193_vm1, %v256_v4, 0.0  ;;  %v258_v24 = vmul.f32 %v2120_v37, %v2120_v37 }
 0x181   :  { %v2138_v11 = vsub.f32 %v1906_v44, %v575_v42  ;;  %v2141_v38 = vsub.f32 %v1910_v46, %v575_v42  ;;  %v231_v40 = vmul.f32 0.0052083335, %v213_v45  ;;  %v276_v51 = vadd.f32 %v275_v29, %v255_v49 }
 0x182   :  { %v217_v21 = vpop.xlane.xlu1 %216  ;;  %v600_v15 = vmul.f32 %v2127_v50, %v2127_v50  ;;  %v601_v48 = vmul.f32 %v2130_v30, %v2130_v30  ;;  %v279_v34 = vsel %vm193_vm1, %v258_v24, 0.0  ;;  %618 = vadd.xlane.f32.xlu1 %v617_v25 }
 0x183   :  { %v2149_v39 = vsub.f32 %v1920_v53, %v231_v40  ;;  %v2152_v44 = vsub.f32 %v1924_v55, %v231_v40  ;;  %v232_v9 = vmul.f32 0.0052083335, %v217_v21  ;;  %277 = vadd.xlane.f32.xlu0 %v276_v51  ;;  %v280_v4 = vadd.f32 %v279_v34, %v257_v26 }
 0x184   :  { %v559_v46 = vpop.xlane.xlu0 %558  ;;  %v620_v49 = vsel %vm193_vm1, %v601_v48, 0.0  ;;  %v602_v42 = vmul.f32 %v2138_v11, %v2138_v11  ;;  %v603_v45 = vmul.f32 %v2141_v38, %v2141_v38 }
 0x185   :  { %v2160_v29 = vsub.f32 %v1930_v58, %v232_v9  ;;  %v2163_v53 = vsub.f32 %v1936_v61, %v232_v9  ;;  %v576_v55 = vmul.f32 0.0052083335, %v559_v46  ;;  %v621_v24 = vadd.f32 %v620_v49, %v600_v15 }
 0x186   :  { %v563_v40 = vpop.xlane.xlu1 %562  ;;  %v259_v25 = vmul.f32 %v2149_v39, %v2149_v39  ;;  %v260_v26 = vmul.f32 %v2152_v44, %v2152_v44  ;;  %v624_v51 = vsel %vm193_vm1, %v603_v45, 0.0  ;;  %281 = vadd.xlane.f32.xlu1 %v280_v4 }
 0x187   :  { %v2171_v21 = vsub.f32 %v1922_v54, %v576_v55  ;;  %v2174_v58 = vsub.f32 %v1926_v56, %v576_v55  ;;  %v577_v48 = vmul.f32 0.0052083335, %v563_v40  ;;  %622 = vadd.xlane.f32.xlu0 %v621_v24  ;;  %v625_v34 = vadd.f32 %v624_v51, %v602_v42  ;;  %v1584_v54 = vld [vmem:[%s2764_s12 + $0x34] ss:$8 sps:$4 sm:$0xff]   ;;  %v1582_v42 = vld [vmem:[%s2764_s12 + $0x30] ss:$8 sps:$4 sm:$0xff]  }
 0x188   :  { %v221_v61 = vpop.xlane.xlu0 %220  ;;  %v283_v15 = vsel %vm193_vm1, %v260_v26, 0.0  ;;  %v261_v9 = vmul.f32 %v2160_v29, %v2160_v29  ;;  %v262_v46 = vmul.f32 %v2163_v53, %v2163_v53  ;;  %1301 = vmatprep.subr.bf16.mxu1 %v1584_v54 }
 0x189   :  { %v2185_v56 = vsub.f32 %v1934_v60, %v577_v48  ;;  %v2188_v49 = vsub.f32 %v1938_v62, %v577_v48  ;;  %v233_v4 = vmul.f32 0.0052083335, %v221_v61  ;;  %v284_v45 = vadd.f32 %v283_v15, %v259_v25  ;;  %1302 = vmatpush1.bf16.msra.mxu1 %v1582_v42 }
 0x18a   :  { %v225_v55 = vpop.xlane.xlu1 %224  ;;  %v604_v24 = vmul.f32 %v2171_v21, %v2171_v21  ;;  %v605_v40 = vmul.f32 %v2174_v58, %v2174_v58  ;;  %v287_v26 = vsel %vm193_vm1, %v262_v46, 0.0  ;;  %626 = vadd.xlane.f32.xlu1 %v625_v34 }
 0x18b   :  { %v2199_v60 = vsub.f32 %v1948_v5, %v233_v4  ;;  %v2202_v62 = vsub.f32 %v1952_v7, %v233_v4  ;;  %285 = vadd.xlane.f32.xlu0 %v284_v45  ;;  %v234_v25 = vmul.f32 0.0052083335, %v225_v55  ;;  %v288_v61 = vadd.f32 %v287_v26, %v261_v9  ;;  %v1587_v5 = vld [vmem:[%s2764_s12 + $0x44] ss:$8 sps:$4 sm:$0xff]   ;;  %v1585_v9 = vld [vmem:[%s2764_s12 + $0x40] ss:$8 sps:$4 sm:$0xff]  }
 0x18c   :  { %v567_v51 = vpop.xlane.xlu0 %566  ;;  %v628_v48 = vsel %vm193_vm1, %v605_v40, 0.0  ;;  %v606_v15 = vmul.f32 %v2185_v56, %v2185_v56  ;;  %v607_v46 = vmul.f32 %v2188_v49, %v2188_v49  ;;  %1303 = vmatprep.subr.bf16.mxu1 %v1587_v5  ;;  %v1588_v5 = vld [vmem:[%s2764_s12 + $0x50] ss:$8 sps:$4 sm:$0xff]  }
 0x18d   :  { %v2213_v7 = vsub.f32 %v1958_v10, %v234_v25  ;;  %v2216_v34 = vsub.f32 %v1964_v13, %v234_v25  ;;  %v578_v54 = vmul.f32 0.0052083335, %v567_v51  ;;  %v629_v4 = vadd.f32 %v628_v48, %v604_v24  ;;  %1304 = vmatpush1.bf16.msra.mxu1 %v1585_v9  ;;  %v1593_v9 = vld [vmem:[%s2764_s12 + $0x64] ss:$8 sps:$4 sm:$0xff]  }
 0x18e   :  { %v571_v45 = vpop.xlane.xlu1 %570  ;;  %v263_v42 = vmul.f32 %v2199_v60, %v2199_v60  ;;  %v264_v55 = vmul.f32 %v2202_v62, %v2202_v62  ;;  %v632_v40 = vsel %vm193_vm1, %v607_v46, 0.0  ;;  %289 = vadd.xlane.f32.xlu1 %v288_v61 }
 0x18f   :  { %2800 = vst [vmem:[#allocation12_spill] sm:$0xff] %v2213_v7  ;;  %v2227_v10 = vsub.f32 %v1950_v6, %v578_v54  ;;  %v2230_v13 = vsub.f32 %v1954_v8, %v578_v54  ;;  %630 = vadd.xlane.f32.xlu0 %v629_v4  ;;  %v579_v24 = vmul.f32 0.0052083335, %v571_v45  ;;  %v633_v25 = vadd.f32 %v632_v40, %v606_v15  ;;  %v1590_v6 = vld [vmem:[%s2764_s12 + $0x54] ss:$8 sps:$4 sm:$0xff]  }
 0x190   :  { %v291_v26 = vsel %vm193_vm1, %v264_v55, 0.0  ;;  %v265_v51 = vmul.f32 %v2213_v7, %v2213_v7  ;;  %v266_v48 = vmul.f32 %v2216_v34, %v2216_v34  ;;  %1305 = vmatprep.subr.bf16.mxu1 %v1590_v6  ;;  %v1591_v40 = vld [vmem:[%s2764_s12 + $0x60] ss:$8 sps:$4 sm:$0xff]  }
 0x191   :  { %2801 = vst [vmem:[#allocation13_spill] sm:$0xff] %v2227_v10  ;;  %v2241_v8 = vsub.f32 %v1962_v12, %v579_v24  ;;  %v2244_v61 = vsub.f32 %v1966_v14, %v579_v24  ;;  %v292_v46 = vadd.f32 %v291_v26, %v263_v42  ;;  %v608_v15 = vmul.f32 %v2227_v10, %v2227_v10  ;;  %v1596_v26 = vld [vmem:[%s2764_s12 + $0x74] ss:$8 sps:$4 sm:$0xff]   ;;  %v1597_v6 = vld [vmem:[%s2764_s12 + $0x80] ss:$8 sps:$4 sm:$0xff]  }
 0x192   :  { %v609_v54 = vmul.f32 %v2230_v13, %v2230_v13  ;;  %v295_v4 = vsel %vm193_vm1, %v266_v48, 0.0  ;;  %634 = vadd.xlane.f32.xlu1 %v633_v25  ;;  %1306 = vmatpush1.bf16.msra.mxu1 %v1588_v5  ;;  %v1599_v48 = vld [vmem:[%s2764_s12 + $0x84] ss:$8 sps:$4 sm:$0xff]  }
 0x193   :  { %2802 = vst [vmem:[#allocation14_spill] sm:$0xff] %v2241_v8  ;;  %293 = vadd.xlane.f32.xlu0 %v292_v46  ;;  %v611_v12 = vmul.f32 %v2244_v61, %v2244_v61  ;;  %v296_v42 = vadd.f32 %v295_v4, %v265_v51  ;;  %v610_v55 = vmul.f32 %v2241_v8, %v2241_v8  ;;  %v1594_v51 = vld [vmem:[%s2764_s12 + $0x70] ss:$8 sps:$4 sm:$0xff]  }
 0x194   :  { %v636_v14 = vsel %vm193_vm1, %v609_v54, 0.0  ;;  %1307 = vmatprep.subr.bf16.mxu1 %v1593_v9  ;;  %v1600_v46 = vld [vmem:[%s2764_s12 + $0x90] ss:$8 sps:$4 sm:$0xff]   ;;  %v340_v54 = vlaneseq }
 0x195   :  { %v637_v45 = vadd.f32 %v636_v14, %v608_v15  ;;  %v640_v24 = vsel %vm193_vm1, %v611_v12, 0.0 }
 0x196   :  { %297 = vadd.xlane.f32.xlu1 %v296_v42  ;;  %1308 = vmatpush1.bf16.msra.mxu1 %v1591_v40  ;;  %v641_v25 = vadd.f32 %v640_v24, %v610_v55  ;;  %v341_v9 = vshrl.u32 %v340_v54, 7 }
 0x197   :  { %638 = vadd.xlane.f32.xlu0 %v637_v45  ;;  %1309 = vmatprep.subr.bf16.mxu1 %v1596_v26 }
 0x19a   :  { %642 = vadd.xlane.f32.xlu1 %v641_v25  ;;  %1310 = vmatpush1.bf16.msra.mxu1 %v1594_v51  ;;  %v2304_v25 = vsub.s32 0, %v341_v9  ;;  %v191_v51 = vld [vmem:[%s2765_s4] sm:$0x3] }
 0x19b   :  { %855 = vadd.xlane.f32.xlu0 %v1989_v35  ;;  %1311 = vmatprep.subr.bf16.mxu1 %v1599_v48  ;;  %v1602_v35 = vld [vmem:[%s2764_s12 + $0x94] ss:$8 sps:$4 sm:$0xff]  }
 0x19c   :  { %2803 = vst [vmem:[#allocation15_spill] sm:$0xff] %v2304_v25 }
 0x19e   :  { %859 = vadd.xlane.f32.xlu1 %v1992_v36  ;;  %1312 = vmatpush1.bf16.msra.mxu1 %v1597_v6  ;;  %v1603_v36 = vld [vmem:[%s2764_s12 + $0xa0] ss:$8 sps:$4 sm:$0xff]  }
 0x19f   :  { %863 = vadd.xlane.f32.xlu0 %v2009_v52  ;;  %1313 = vmatprep.subr.bf16.mxu1 %v1602_v35  ;;  %v1605_v52 = vld [vmem:[%s2764_s12 + $0xa4] ss:$8 sps:$4 sm:$0xff]  }
 0x1a2   :  { %867 = vadd.xlane.f32.xlu1 %v2012_v57  ;;  %1314 = vmatpush1.bf16.msra.mxu1 %v1600_v46  ;;  %v1606_v57 = vld [vmem:[%s2764_s12 + $0xb0] ss:$8 sps:$4 sm:$0xff]  }
 0x1a3   :  { %871 = vadd.xlane.f32.xlu0 %v2023_v2  ;;  %1315 = vmatprep.subr.bf16.mxu1 %v1605_v52  ;;  %v1608_v2 = vld [vmem:[%s2764_s12 + $0xb4] ss:$8 sps:$4 sm:$0xff]  }
 0x1a6   :  { %875 = vadd.xlane.f32.xlu1 %v2039_v17  ;;  %1316 = vmatpush1.bf16.msra.mxu1 %v1603_v36 }
 0x1a7   :  { %879 = vadd.xlane.f32.xlu0 %v2036_v16  ;;  %1317 = vmatprep.subr.bf16.mxu1 %v1608_v2  ;;  %v192_v2 = vld [vmem:[%s2766_s5] sm:$0x3] }
 0x1aa   :  { %883 = vadd.xlane.f32.xlu1 %v2046_v20  ;;  %1318 = vmatpush1.bf16.msra.mxu1 %v1606_v57  ;;  %v2306_v20 = vsub.s32 1, %v341_v9  ;;  %v2315_v57 = vrot.slane %v191_v51, %v2304_v25 }
 0x1ac   :  { %2804 = vst [vmem:[#allocation16_spill] sm:$0xff] %v2306_v20 }
 0x208   :  { %v270_v15 = vpop.xlane.xlu0 %269 }
 0x209   :  { %v299_v5 = vmul.f32 0.0052083335, %v270_v15  ;;  %v2318_v15 = vrot.slane %v191_v51, %v2306_v20 }
 0x20b   :  { %v307_v4 = vadd.f32 1e-05, %v299_v5  ;;  %v274_v12 = vpop.xlane.xlu1 %273 }
 0x20c   :  { %v615_v16 = vpop.xlane.xlu0 %614  ;;  %v300_v14 = vmul.f32 0.0052083335, %v274_v12 }
 0x20d   :  { %1609 = vrsqrt.f32 %v307_v4  ;;  %v644_v17 = vmul.f32 0.0052083335, %v615_v16 }
 0x20e   :  { %v308_v42 = vadd.f32 1e-05, %v300_v14 }
 0x20f   :  { %v652_v45 = vadd.f32 1e-05, %v644_v17  ;;  %v619_v40 = vpop.xlane.xlu1 %618  ;;  %v538_v17 = vld [vmem:[%s2767_s7] sm:$0x3] }
 0x210   :  { %v278_v55 = vpop.xlane.xlu0 %277  ;;  %v645_v26 = vmul.f32 0.0052083335, %v619_v40  ;;  %v2337_v51 = vrot.slane %v538_v17, %v2304_v25 }
 0x211   :  { %1611 = vrsqrt.f32 %v652_v45  ;;  %v301_v24 = vmul.f32 0.0052083335, %v278_v55  ;;  %v2326_v45 = vrot.slane %v192_v2, %v2306_v20 }
 0x212   :  { %1613 = vrsqrt.f32 %v308_v42  ;;  %v653_v6 = vadd.f32 1e-05, %v645_v26 }
 0x213   :  { %v309_v48 = vadd.f32 1e-05, %v301_v24  ;;  %v282_v46 = vpop.xlane.xlu1 %281 }
 0x214   :  { %v623_v35 = vpop.xlane.xlu0 %622  ;;  %v302_v36 = vmul.f32 0.0052083335, %v282_v46 }
 0x215   :  { %1615 = vrsqrt.f32 %v309_v48  ;;  %v646_v52 = vmul.f32 0.0052083335, %v623_v35 }
 0x216   :  { %1617 = vrsqrt.f32 %v653_v6  ;;  %v310_v4 = vadd.f32 1e-05, %v302_v36  ;;  %v2340_v6 = vrot.slane %v538_v17, %v2306_v20 }
 0x217   :  { %v1610_v5 = vpop.eup %1609  ;;  %v654_v54 = vadd.f32 1e-05, %v646_v52  ;;  %v627_v9 = vpop.xlane.xlu1 %626 }
 0x218   :  { %v323_v16 = vmul.f32 %v1610_v5, %v2070_v31  ;;  %v324_v12 = vmul.f32 %v1610_v5, %v2073_v1  ;;  %v286_v14 = vpop.xlane.xlu0 %285  ;;  %v647_v55 = vmul.f32 0.0052083335, %v627_v9  ;;  %v2331_v31 = vrot.slane %v192_v2, %v2304_v25  ;;  %v539_v1 = vld [vmem:[%s2768_s8] sm:$0x3] }
 0x219   :  { %1619 = vrsqrt.f32 %v654_v54  ;;  %v303_v42 = vmul.f32 0.0052083335, %v286_v14  ;;  %v2348_v14 = vrot.slane %v539_v1, %v2304_v25  ;;  %v2351_v9 = vrot.slane %v539_v1, %v2306_v20 }
 0x21a   :  { %v350_v40 = vmul.f32 %v2315_v57, %v323_v16  ;;  %1621 = vrsqrt.f32 %v310_v4  ;;  %v351_v24 = vmul.f32 %v2318_v15, %v324_v12  ;;  %v655_v36 = vadd.f32 1e-05, %v647_v55 }
 0x21b   :  { %v1612_v26 = vpop.eup %1611  ;;  %v311_v48 = vadd.f32 1e-05, %v303_v42  ;;  %v290_v5 = vpop.xlane.xlu1 %289 }
 0x21c   :  { %v1614_v35 = vpop.eup %1613  ;;  %v668_v46 = vmul.f32 %v1612_v26, %v2076_v47  ;;  %v669_v52 = vmul.f32 %v1612_v26, %v2067_v18  ;;  %v631_v2 = vpop.xlane.xlu0 %630  ;;  %v378_v54 = vadd.f32 %v2326_v45, %v351_v24  ;;  %v304_v17 = vmul.f32 0.0052083335, %v290_v5 }
 0x21d   :  { %v325_v4 = vmul.f32 %v1614_v35, %v2088_v23  ;;  %v326_v16 = vmul.f32 %v1614_v35, %v2091_v22  ;;  %v648_v12 = vmul.f32 0.0052083335, %v631_v2  ;;  %1623 = vrsqrt.f32 %v311_v48 }
 0x21e   :  { %v2354_v18 = vadd.f32 %v2331_v31, %v350_v40  ;;  %v695_v42 = vmul.f32 %v2337_v51, %v668_v46  ;;  %v696_v22 = vmul.f32 %v2340_v6, %v669_v52  ;;  %1625 = vrsqrt.f32 %v655_v36 }
 0x21f   :  { %v2356_v47 = vpop.eup %1615  ;;  %v656_v55 = vadd.f32 1e-05, %v648_v12  ;;  %v353_v23 = vmul.f32 %v2318_v15, %v326_v16  ;;  %v352_v26 = vmul.f32 %v2315_v57, %v325_v4  ;;  %v312_v48 = vadd.f32 1e-05, %v304_v17  ;;  %v635_v1 = vpop.xlane.xlu1 %634 }
 0x220   :  { %v1618_v24 = vpop.eup %1617  ;;  %v294_v35 = vpop.xlane.xlu0 %293  ;;  %v394_v2 = vmax.f32 %v378_v54, 0.0  ;;  %v328_v46 = vmul.f32 %v2356_v47, %v2110_v3  ;;  %v649_v16 = vmul.f32 0.0052083335, %v635_v1  ;;  %v723_v52 = vadd.f32 %v2351_v9, %v696_v22 }
 0x221   :  { %v670_v40 = vmul.f32 %v1618_v24, %v2094_v0  ;;  %v671_v5 = vmul.f32 %v1618_v24, %v2085_v19  ;;  %1627 = vrsqrt.f32 %v656_v55  ;;  %v305_v20 = vmul.f32 0.0052083335, %v294_v35 }
 0x222   :  { %1629 = vrsqrt.f32 %v312_v48  ;;  %v380_v54 = vadd.f32 %v2326_v45, %v353_v23  ;;  %v657_v19 = vadd.f32 1e-05, %v649_v16  ;;  %v739_v35 = vmax.f32 %v723_v52, 0.0 }
 0x223   :  { %v2367_v12 = vpop.eup %1619  ;;  %v697_v36 = vmul.f32 %v2337_v51, %v670_v40  ;;  %v313_v4 = vadd.f32 1e-05, %v305_v20  ;;  %v698_v0 = vmul.f32 %v2340_v6, %v671_v5  ;;  %v298_v24 = vpop.xlane.xlu1 %297  ;;  %v393_v3 = vmax.f32 %v2354_v18, 0.0 }
 0x224   :  { %v2372_v17 = vpop.eup %1621  ;;  %v639_v55 = vpop.xlane.xlu0 %638  ;;  %v722_v48 = vadd.f32 %v2348_v14, %v695_v42  ;;  %v306_v1 = vmul.f32 0.0052083335, %v298_v24  ;;  %v379_v40 = vadd.f32 %v2331_v31, %v352_v26  ;;  %v673_v20 = vmul.f32 %v2367_v12, %v2130_v30 }
 0x225   :  { %1631 = vrsqrt.f32 %v313_v4  ;;  %v650_v22 = vmul.f32 0.0052083335, %v639_v55  ;;  %v330_v23 = vmul.f32 %v2372_v17, %v2120_v37  ;;  %v725_v5 = vadd.f32 %v2351_v9, %v698_v0 }
 0x226   :  { %1633 = vrsqrt.f32 %v657_v19  ;;  %v314_v52 = vadd.f32 1e-05, %v306_v1  ;;  %v396_v25 = vmax.f32 %v380_v54, 0.0  ;;  %v724_v18 = vadd.f32 %v2348_v14, %v697_v36 }
 0x227   :  { %v658_v16 = vadd.f32 1e-05, %v650_v22  ;;  %v2383_v42 = vpop.eup %1623  ;;  %v643_v55 = vpop.xlane.xlu1 %642  ;;  %v741_v24 = vmax.f32 %v725_v5, 0.0  ;;  %v1068_v26 = vmul.f32 %v739_v35, %v394_v2  ;;  %v738_v8 = vmax.f32 %v722_v48, 0.0 }
 0x228   :  { %v856_v4 = vpop.xlane.xlu0 %855  ;;  %v355_v30 = vmul.f32 %v2318_v15, %v328_v46  ;;  %v651_v37 = vmul.f32 0.0052083335, %v643_v55  ;;  %v395_v19 = vmax.f32 %v379_v40, 0.0  ;;  %v2386_v7 = vpop.eup %1625  ;;  %v740_v54 = vmax.f32 %v724_v18, 0.0 }
 0x229   :  { %1635 = vrsqrt.f32 %v658_v16  ;;  %v885_v10 = vmul.f32 0.0052083335, %v856_v4  ;;  %v1070_v0 = vmul.f32 %v741_v24, %v396_v25  ;;  %v357_v36 = vmul.f32 %v2318_v15, %v330_v23 }
 0x22a   :  { %1637 = vrsqrt.f32 %v314_v52  ;;  %v659_v46 = vadd.f32 1e-05, %v651_v37  ;;  %v382_v35 = vadd.f32 %v2326_v45, %v355_v30  ;;  %v2402_v40 = vmul.f32 %v2383_v42, %v2152_v44 }
 0x22b   :  { %v2389_v22 = vpop.eup %1627  ;;  %v2392_v1 = vsub.f32 %v1976_v27, %v885_v10  ;;  %v2395_v2 = vsub.f32 %v1978_v28, %v885_v10  ;;  %v1084_v5 = vpack.c.bf16 %v1070_v0, %v1068_v26  ;;  %v860_v23 = vpop.xlane.xlu1 %859  ;;  %v1067_v16 = vmul.f32 %v738_v8, %v393_v3 }
 0x22c   :  { %v2398_v48 = vpop.eup %1629  ;;  %v864_v25 = vpop.xlane.xlu0 %863  ;;  %v1069_v52 = vmul.f32 %v740_v54, %v395_v19  ;;  %v675_v27 = vmul.f32 %v2386_v7, %v2141_v38  ;;  %v2408_v28 = vmul.f32 %v2389_v22, %v2174_v58  ;;  %v886_v18 = vmul.f32 0.0052083335, %v860_v23 }
 0x22d   :  { %v887_v10 = vmul.f32 0.0052083335, %v864_v25  ;;  %1639 = vrsqrt.f32 %v659_v46  ;;  %1540 = vmatprep.mubr.msk.bf16.mxu1 %vm193_vm1, %v1084_v5  ;;  %v909_v44 = vmul.f32 %v2392_v1, %v2392_v1  ;;  %v910_v8 = vmul.f32 %v2395_v2, %v2395_v2 }
 0x22e   :  { %v1083_v4 = vpack.c.bf16 %v1069_v52, %v1067_v16  ;;  %v2419_v38 = vmul.f32 %v2398_v48, %v2163_v53  ;;  %v384_v55 = vadd.f32 %v2326_v45, %v357_v36  ;;  %v398_v24 = vmax.f32 %v382_v35, 0.0  ;;  %v2805_v16 = vld [vmem:[#allocation4_spill] sm:$0xff] }
 0x22f   :  { %v2415_v3 = vpop.eup %1631  ;;  %v2422_v58 = vsub.f32 %v1994_v41, %v887_v10  ;;  %v2428_v30 = vsub.f32 %v1996_v43, %v887_v10  ;;  %v2431_v37 = vsub.f32 %v1982_v32, %v886_v18  ;;  %v868_v0 = vpop.xlane.xlu1 %867  ;;  %v925_v53 = vsel %vm193_vm1, %v910_v8, 0.0 }
 0x230   :  { %v2425_v26 = vpop.eup %1633  ;;  %1328 = vmatmul.mubr.bf16.vlgmr.msra.gmra.mrb[16].mxu1 %v1083_v4  ;;  %v872_v19 = vpop.xlane.xlu0 %871  ;;  %v700_v54 = vmul.f32 %v2340_v6, %v673_v20  ;;  %v2436_v41 = vsub.f32 %v1984_v33, %v886_v18  ;;  %v888_v46 = vmul.f32 0.0052083335, %v868_v0  ;;  %v926_v35 = vadd.f32 %v925_v53, %v909_v44  ;;  %v2807_v44 = vld [vmem:[#allocation2_spill] sm:$0xff] }
 0x231   :  { %v889_v36 = vmul.f32 0.0052083335, %v872_v19  ;;  %v702_v25 = vmul.f32 %v2340_v6, %v675_v27  ;;  %v327_v32 = vmul.f32 %v2356_v47, %v2107_v63  ;;  %v329_v5 = vmul.f32 %v2372_v17, %v2117_v59  ;;  %v2806_v63 = vld [vmem:[#allocation5_spill] sm:$0xff] }
 0x232   :  { %v727_v43 = vadd.f32 %v2351_v9, %v700_v54  ;;  %v2448_v20 = vmul.f32 %v2415_v3, %v2202_v62  ;;  %v679_v33 = vmul.f32 %v2425_v26, %v2188_v49  ;;  %927 = vadd.xlane.f32.xlu0 %v926_v35  ;;  %v400_v27 = vmax.f32 %v384_v55, 0.0  ;;  %v2808_v49 = vld [vmem:[#allocation3_spill] sm:$0xff] }
 0x233   :  { %v2444_v23 = vpop.eup %1635  ;;  %v2453_v52 = vsub.f32 %v2805_v16, %v889_v36  ;;  %v2458_v47 = vsub.f32 %v2806_v63, %v889_v36  ;;  %v729_v17 = vadd.f32 %v2351_v9, %v702_v25  ;;  %v876_v4 = vpop.xlane.xlu1 %875  ;;  %v354_v62 = vmul.f32 %v2315_v57, %v327_v32 }
 0x234   :  { %v2455_v10 = vpop.eup %1637  ;;  %v880_v59 = vpop.xlane.xlu0 %879  ;;  %v743_v18 = vmax.f32 %v727_v43, 0.0  ;;  %v2463_v8 = vsub.f32 %v2807_v44, %v888_v46  ;;  %v2466_v19 = vsub.f32 %v2808_v49, %v888_v46  ;;  %v890_v55 = vmul.f32 0.0052083335, %v876_v4  ;;  %v2809_v43 = vld [vmem:[#allocation8_spill] sm:$0xff] }
 0x235   :  { %v891_v0 = vmul.f32 0.0052083335, %v880_v59  ;;  %v2470_v53 = vmul.f32 %v2444_v23, %v2230_v13  ;;  %v745_v54 = vmax.f32 %v729_v17, 0.0  ;;  %v356_v36 = vmul.f32 %v2315_v57, %v329_v5  ;;  %v2810_v13 = vld [vmem:[#allocation9_spill] sm:$0xff]  ;;  %v2811_v5 = vld [vmem:[#allocation6_spill] sm:$0xff] }
 0x236   :  { %v672_v35 = vmul.f32 %v2367_v12, %v2127_v50  ;;  %v2477_v25 = vmul.f32 %v2455_v10, %v2216_v34  ;;  %v1072_v46 = vmul.f32 %v743_v18, %v398_v24  ;;  %v381_v16 = vadd.f32 %v2331_v31, %v354_v62  ;;  %v2812_v50 = vld [vmem:[#allocation7_spill] sm:$0xff] }
 0x237   :  { %v2480_v32 = vsub.f32 %v2809_v43, %v891_v0  ;;  %v2483_v63 = vpop.eup %1639  ;;  %v2486_v59 = vsub.f32 %v2810_v13, %v891_v0  ;;  %v1074_v17 = vmul.f32 %v745_v54, %v400_v27  ;;  %v2489_v4 = vsub.f32 %v2811_v5, %v890_v55 }
 0x238   :  { %v2492_v12 = vsub.f32 %v2812_v50, %v890_v55  ;;  %v674_v34 = vmul.f32 %v2386_v7, %v2138_v11  ;;  %v699_v44 = vmul.f32 %v2337_v51, %v672_v35  ;;  %v913_v24 = vmul.f32 %v2422_v58, %v2422_v58 }
 0x239   :  { %v914_v18 = vmul.f32 %v2428_v30, %v2428_v30  ;;  %v1086_v62 = vpack.c.bf16 %v1074_v17, %v1072_v46  ;;  %v383_v27 = vadd.f32 %v2331_v31, %v356_v36  ;;  %v911_v49 = vmul.f32 %v2431_v37, %v2431_v37 }
 0x23a   :  { %v912_v0 = vmul.f32 %v2436_v41, %v2436_v41  ;;  %v2508_v11 = vmul.f32 %v2483_v63, %v2244_v61  ;;  %v701_v7 = vmul.f32 %v2337_v51, %v674_v34  ;;  %v726_v55 = vadd.f32 %v2348_v14, %v699_v44 }
 0x23b   :  { %v933_v54 = vsel %vm193_vm1, %v914_v18, 0.0  ;;  %1541 = vmatprep.mubr.msk.bf16.mxu1 %vm193_vm1, %v1086_v62  ;;  %v917_v43 = vmul.f32 %v2453_v52, %v2453_v52  ;;  %v918_v46 = vmul.f32 %v2458_v47, %v2458_v47  ;;  %v397_v13 = vmax.f32 %v381_v16, 0.0 }
 0x23c   :  { %v934_v35 = vadd.f32 %v933_v54, %v913_v24  ;;  %v929_v36 = vsel %vm193_vm1, %v912_v0, 0.0  ;;  %v728_v61 = vadd.f32 %v2348_v14, %v701_v7  ;;  %v742_v17 = vmax.f32 %v726_v55, 0.0 }
 0x23d   :  { %v930_v5 = vadd.f32 %v929_v36, %v911_v49  ;;  %v399_v50 = vmax.f32 %v383_v27, 0.0  ;;  %v941_v34 = vsel %vm193_vm1, %v918_v46, 0.0  ;;  %v915_v44 = vmul.f32 %v2463_v8, %v2463_v8 }
 0x23e   :  { %935 = vadd.xlane.f32.xlu0 %v934_v35  ;;  %v916_v24 = vmul.f32 %v2466_v19, %v2466_v19  ;;  %v744_v18 = vmax.f32 %v728_v61, 0.0  ;;  %v1071_v62 = vmul.f32 %v742_v17, %v397_v13  ;;  %v942_v0 = vadd.f32 %v941_v34, %v917_v43 }
 0x23f   :  { %931 = vadd.xlane.f32.xlu1 %v930_v5  ;;  %v359_v16 = vmul.f32 %v2318_v15, %v2402_v40  ;;  %v361_v27 = vmul.f32 %v2318_v15, %v2419_v38  ;;  %v704_v49 = vmul.f32 %v2340_v6, %v2408_v28  ;;  %v706_v55 = vmul.f32 %v2340_v6, %v679_v33 }
 0x240   :  { %v937_v7 = vsel %vm193_vm1, %v916_v24, 0.0  ;;  %v1073_v54 = vmul.f32 %v744_v18, %v399_v50  ;;  %v331_v43 = vmul.f32 %v2383_v42, %v2149_v39  ;;  %v333_v38 = vmul.f32 %v2398_v48, %v2160_v29 }
 0x241   :  { %v938_v35 = vadd.f32 %v937_v7, %v915_v44  ;;  %v386_v36 = vadd.f32 %v2326_v45, %v359_v16  ;;  %v388_v40 = vadd.f32 %v2326_v45, %v361_v27  ;;  %v731_v46 = vadd.f32 %v2351_v9, %v704_v49 }
 0x242   :  { %943 = vadd.xlane.f32.xlu0 %v942_v0  ;;  %v733_v13 = vadd.f32 %v2351_v9, %v706_v55  ;;  %v1085_v28 = vpack.c.bf16 %v1073_v54, %v1071_v62  ;;  %v358_v61 = vmul.f32 %v2315_v57, %v331_v43  ;;  %v676_v17 = vmul.f32 %v2389_v22, %v2171_v21 }
 0x243   :  { %939 = vadd.xlane.f32.xlu1 %v938_v35  ;;  %v402_v33 = vmax.f32 %v386_v36, 0.0  ;;  %v404_v5 = vmax.f32 %v388_v40, 0.0  ;;  %v747_v39 = vmax.f32 %v731_v46, 0.0  ;;  %v360_v50 = vmul.f32 %v2315_v57, %v333_v38 }
 0x244   :  { %v749_v42 = vmax.f32 %v733_v13, 0.0  ;;  %1338 = vmatmul.mubr.bf16.gmra.mrb[20].mxu1 %v1085_v28  ;;  %v385_v34 = vadd.f32 %v2331_v31, %v358_v61  ;;  %v678_v44 = vmul.f32 %v2425_v26, %v2185_v56  ;;  %v703_v29 = vmul.f32 %v2337_v51, %v676_v17 }
 0x245   :  { %v921_v48 = vmul.f32 %v2480_v32, %v2480_v32  ;;  %v1076_v24 = vmul.f32 %v747_v39, %v402_v33  ;;  %v387_v21 = vadd.f32 %v2331_v31, %v360_v50  ;;  %v922_v22 = vmul.f32 %v2486_v59, %v2486_v59  ;;  %v2813_v39 = vld [vmem:[#allocation12_spill] sm:$0xff] }
 0x246   :  { %v1078_v18 = vmul.f32 %v749_v42, %v404_v5  ;;  %v401_v62 = vmax.f32 %v385_v34, 0.0  ;;  %v705_v0 = vmul.f32 %v2337_v51, %v678_v44  ;;  %v730_v16 = vadd.f32 %v2348_v14, %v703_v29 }
 0x247   :  { %v919_v56 = vmul.f32 %v2489_v4, %v2489_v4  ;;  %v403_v7 = vmax.f32 %v387_v21, 0.0  ;;  %v949_v27 = vsel %vm193_vm1, %v922_v22, 0.0  ;;  %v920_v49 = vmul.f32 %v2492_v12, %v2492_v12 }
 0x248   :  { %v1088_v26 = vpack.c.bf16 %v1078_v18, %v1076_v24  ;;  %v732_v55 = vadd.f32 %v2348_v14, %v705_v0  ;;  %v746_v54 = vmax.f32 %v730_v16, 0.0  ;;  %v950_v35 = vadd.f32 %v949_v27, %v921_v48  ;;  %v2815_v48 = vld [vmem:[#allocation14_spill] sm:$0xff] }
 0x249   :  { %v363_v36 = vmul.f32 %v2318_v15, %v2448_v20  ;;  %v945_v43 = vsel %vm193_vm1, %v920_v49, 0.0  ;;  %v365_v40 = vmul.f32 %v2318_v15, %v2477_v25  ;;  %v708_v46 = vmul.f32 %v2340_v6, %v2470_v53  ;;  %v1118_v49 = vld [vmem:[%s2769_s2 + $0x18] sm:$0xff] }
 0x24a   :  { %1542 = vmatprep.mubr.msk.bf16.mxu1 %vm193_vm1, %v1088_v26  ;;  %v710_v13 = vmul.f32 %v2340_v6, %v2508_v11  ;;  %v748_v38 = vmax.f32 %v732_v55, 0.0  ;;  %v1075_v28 = vmul.f32 %v746_v54, %v401_v62  ;;  %951 = vadd.xlane.f32.xlu0 %v950_v35  ;;  %v946_v33 = vadd.f32 %v945_v43, %v919_v56  ;;  %v2814_v11 = vld [vmem:[#allocation13_spill] sm:$0xff]  ;;  %v1119_v55 = vld [vmem:[%s2769_s2 + $0x20] sm:$0xff]  ;;  %v1120_v54 = vld [vmem:[%s2769_s2 + $0x28] sm:$0xff] }
 0x24b   :  { %v390_v61 = vadd.f32 %v2326_v45, %v363_v36  ;;  %v392_v20 = vadd.f32 %v2326_v45, %v365_v40  ;;  %v735_v17 = vadd.f32 %v2351_v9, %v708_v46  ;;  %v335_v15 = vmul.f32 %v2415_v3, %v2199_v60  ;;  %v1121_v35 = vld [vmem:[%s2769_s2 + $0x30] sm:$0xff]  ;;  %v884_v36 = vpop.xlane.xlu1 %883  ;;  %v2816_v40 = vld [vmem:[#allocation11_spill] sm:$0xff] }
 0x24c   :  { %v737_v5 = vadd.f32 %v2351_v9, %v710_v13  ;;  %v1077_v25 = vmul.f32 %v748_v38, %v403_v7  ;;  %947 = vadd.xlane.f32.xlu1 %v946_v33  ;;  %v337_v6 = vmul.f32 %v2455_v10, %v2813_v39  ;;  %v680_v42 = vmul.f32 %v2444_v23, %v2814_v11  ;;  %v2817_v13 = vld [vmem:[#allocation10_spill] sm:$0xff] }
 0x24d   :  { %v406_v53 = vmax.f32 %v390_v61, 0.0  ;;  %v408_v50 = vmax.f32 %v392_v20, 0.0  ;;  %v751_v34 = vmax.f32 %v735_v17, 0.0  ;;  %v362_v45 = vmul.f32 %v2315_v57, %v335_v15  ;;  %v1122_v17 = vld [vmem:[%s2769_s2 + $0x38] sm:$0xff] }
 0x24e   :  { %v753_v44 = vmax.f32 %v737_v5, 0.0  ;;  %v1087_v29 = vpack.c.bf16 %v1077_v25, %v1075_v28  ;;  %v364_v9 = vmul.f32 %v2315_v57, %v337_v6  ;;  %v682_v60 = vmul.f32 %v2483_v63, %v2815_v48 }
 0x24f   :  { %v707_v3 = vmul.f32 %v2337_v51, %v680_v42  ;;  %v1080_v24 = vmul.f32 %v751_v34, %v406_v53  ;;  %v389_v10 = vadd.f32 %v2331_v31, %v362_v45  ;;  %v892_v43 = vmul.f32 0.0052083335, %v884_v36 }
 0x250   :  { %v1082_v18 = vmul.f32 %v753_v44, %v408_v50  ;;  %1348 = vmatmul.mubr.bf16.gmra.mrb[24].mxu1 %v1087_v29  ;;  %v391_v23 = vadd.f32 %v2331_v31, %v364_v9  ;;  %v709_v21 = vmul.f32 %v2337_v51, %v682_v60  ;;  %v1116_v31 = vld [vmem:[%s2769_s2 + $0x8] sm:$0xff]  ;;  %v1115_v51 = vld [vmem:[%s2769_s2] sm:$0xff] }
 0x251   :  { %v734_v22 = vadd.f32 %v2348_v14, %v707_v3  ;;  %v405_v63 = vmax.f32 %v389_v10, 0.0  ;;  %v2615_v46 = vsub.f32 %v2816_v40, %v892_v43  ;;  %v2618_v38 = vsub.f32 %v2817_v13, %v892_v43  ;;  %v2819_v40 = vld [vmem:[#allocation16_spill] sm:$0xff] }
 0x252   :  { %v1090_v62 = vpack.c.bf16 %v1082_v18, %v1080_v24  ;;  %v736_v0 = vadd.f32 %v2348_v14, %v709_v21  ;;  %v407_v16 = vmax.f32 %v391_v23, 0.0  ;;  %v1117_v14 = vld [vmem:[%s2769_s2 + $0x10] sm:$0xff] }
 0x253   :  { %v750_v57 = vmax.f32 %v734_v22, 0.0  ;;  %v924_v28 = vmul.f32 %v2615_v46, %v2615_v46  ;;  %v923_v33 = vmul.f32 %v2618_v38, %v2618_v38 }
 0x254   :  { %1543 = vmatprep.mubr.msk.bf16.mxu1 %vm193_vm1, %v1090_v62  ;;  %v752_v56 = vmax.f32 %v736_v0, 0.0 }
 0x255   :  { %v1079_v26 = vmul.f32 %v750_v57, %v405_v63  ;;  %v953_v61 = vsel %vm193_vm1, %v924_v28, 0.0 }
 0x256   :  { %v1081_v7 = vmul.f32 %v752_v56, %v407_v16  ;;  %v954_v20 = vadd.f32 %v953_v61, %v923_v33 }
 0x258   :  { %v1089_v27 = vpack.c.bf16 %v1081_v7, %v1079_v26 }
 0x25a   :  { %1358 = vmatmul.mubr.bf16.gmra.mrb[28].mxu1 %v1089_v27  ;;  %v851_v27 = vld [vmem:[%s2770_s10] sm:$0x3] }
 0x25b   :  { %v2645_v13 = vrot.slane %v851_v27, %v2819_v40 }
 0x25d   :  { %1130 = vperm.xlu1 %1546, %v1116_v31  }
 0x260   :  { %1125 = vperm.xlu0 %1545, %v1115_v51  }
 0x261   :  { %1135 = vperm.xlu1 %1546, %v1117_v14  }
 0x265   :  { %1140 = vperm.xlu1 %1546, %v1118_v49   ;;  %v852_v49 = vld [vmem:[%s2771_s11] sm:$0x3] }
 0x269   :  { %1145 = vperm.xlu1 %1546, %v1119_v55   ;;  %v2818_v55 = vld [vmem:[#allocation15_spill] sm:$0xff] }
 0x26d   :  { %1150 = vperm.xlu1 %1546, %v1120_v54   ;;  %v2641_v54 = vrot.slane %v851_v27, %v2818_v55 }
 0x271   :  { %1155 = vperm.xlu1 %1546, %v1121_v35  }
 0x295   :  { %955 = vadd.xlane.f32.xlu1 %v954_v20 }
 0x2a6   :  { %1160 = vperm.xlu1 %1546, %v1122_v17  }
 0x2bf   :  { %v928_v5 = vpop.xlane.xlu0 %927 }
 0x2c0   :  { %v957_v11 = vmul.f32 0.0052083335, %v928_v5 }
 0x2c2   :  { %v965_v44 = vadd.f32 1e-05, %v957_v11  ;;  %v2650_v11 = vrot.slane %v852_v49, %v2818_v55 }
 0x2c4   :  { %1641 = vrsqrt.f32 %v965_v44 }
 0x2cb   :  { %v936_v15 = vpop.xlane.xlu0 %935 }
 0x2cc   :  { %v932_v25 = vpop.xlane.xlu1 %931  ;;  %v959_v36 = vmul.f32 0.0052083335, %v936_v15 }
 0x2cd   :  { %v958_v50 = vmul.f32 0.0052083335, %v932_v25 }
 0x2ce   :  { %v1642_v7 = vpop.eup %1641 }
 0x2cf   :  { %v2628_v53 = vpop.xlane.xlu0 %943  ;;  %v966_v48 = vadd.f32 1e-05, %v958_v50  ;;  %v981_v35 = vmul.f32 %v1642_v7, %v2392_v1  ;;  %v982_v28 = vmul.f32 %v1642_v7, %v2395_v2 }
 0x2d0   :  { %v940_v39 = vpop.xlane.xlu1 %939 }
 0x2d1   :  { %1643 = vrsqrt.f32 %v966_v48  ;;  %v960_v17 = vmul.f32 0.0052083335, %v940_v39  ;;  %v1008_v15 = vmul.f32 %v2641_v54, %v981_v35 }
 0x2d7   :  { %v2630_v6 = vpop.xlane.xlu0 %951 }
 0x2d9   :  { %v2632_v42 = vpop.xlane.xlu1 %947 }
 0x2db   :  { %v1644_v31 = vpop.eup %1643 }
 0x2dc   :  { %v983_v20 = vmul.f32 %v1644_v31, %v2431_v37  ;;  %v984_v50 = vmul.f32 %v1644_v31, %v2436_v41  ;;  %v1009_v37 = vmul.f32 %v2645_v13, %v982_v28  ;;  %v968_v41 = vadd.f32 1e-05, %v960_v17 }
 0x2dd   :  { %v1131_v60 = vpop.permute.xlu1 %1130  ;;  %v962_v28 = vmul.f32 0.0052083335, %v2632_v42 }
 0x2de   :  { %v1010_v48 = vmul.f32 %v2641_v54, %v983_v20 }
 0x2df   :  { %v1126_v34 = vpop.permute.xlu0 %1125 }
 0x2e1   :  { %v1136_v26 = vpop.permute.xlu1 %1135 }
 0x2e5   :  { %v1141_v51 = vpop.permute.xlu1 %1140 }
 0x2e9   :  { %v1146_v39 = vpop.permute.xlu1 %1145 }
 0x2ed   :  { %v1151_v27 = vpop.permute.xlu1 %1150 }
 0x303   :  { %v1329_v45 = vpop.f32.mrb[16].mxu1 }
 0x304   :  { %v1330_v29 = vadd.f32 %v1329_v45, %v1126_v34  ;;  %v1331_v9 = vpop.f32.mrb[17].mxu1  ;;  %v2655_v45 = vrot.slane %v852_v49, %v2819_v40  ;;  %v961_v49 = vmul.f32 0.0052083335, %v2628_v53 }
 0x305   :  { %v1332_v3 = vadd.f32 %v1331_v9, %v1126_v34  ;;  %v1333_v24 = vpop.f32.mrb[18].mxu1  ;;  %v967_v34 = vadd.f32 1e-05, %v959_v36  ;;  %v963_v36 = vmul.f32 0.0052083335, %v2630_v6  ;;  %v1156_v6 = vpop.permute.xlu1 %1155 }
 0x306   :  { %v1368_v18 = vsub.f32 0.0, %v1330_v29  ;;  %v1334_v10 = vadd.f32 %v1333_v24, %v1131_v60  ;;  %v1335_v23 = vpop.f32.mrb[19].mxu1  ;;  %v1011_v24 = vmul.f32 %v2645_v13, %v984_v50 }
 0x307   :  { %v1369_v21 = vsub.f32 0.0, %v1332_v3  ;;  %v1336_v22 = vadd.f32 %v1335_v23, %v1131_v60 }
 0x308   :  { %v1384_v62 = vmul.f32 1.442695, %v1368_v18  ;;  %v1370_v0 = vsub.f32 0.0, %v1334_v10  ;;  %v1038_v7 = vadd.f32 %v2655_v45, %v1011_v24 }
 0x309   :  { %v1386_v57 = vmul.f32 1.442695, %v1369_v21  ;;  %v1371_v63 = vsub.f32 0.0, %v1336_v22  ;;  %v1035_v21 = vadd.f32 %v2650_v11, %v1008_v15 }
 0x30a   :  { %1645 = vpow2.f32 %v1384_v62  ;;  %v1388_v16 = vmul.f32 1.442695, %v1370_v0  ;;  %v1036_v0 = vadd.f32 %v2655_v45, %v1009_v37  ;;  %v1054_v20 = vmax.f32 %v1038_v7, 0.0 }
 0x30b   :  { %1647 = vpow2.f32 %v1386_v57  ;;  %v1390_v56 = vmul.f32 1.442695, %v1371_v63 }
 0x30c   :  { %1649 = vpow2.f32 %v1388_v16  ;;  %v1037_v16 = vadd.f32 %v2650_v11, %v1010_v48  ;;  %v1052_v35 = vmax.f32 %v1036_v0, 0.0 }
 0x30d   :  { %1651 = vpow2.f32 %v1390_v56 }
 0x30e   :  { %v1053_v40 = vmax.f32 %v1037_v16, 0.0 }
 0x314   :  { %v1646_v14 = vpop.eup %1645 }
 0x315   :  { %v1648_v43 = vpop.eup %1647  ;;  %v1416_v33 = vadd.f32 1.0, %v1646_v14  ;;  %v1051_v14 = vmax.f32 %v1035_v21, 0.0 }
 0x316   :  { %v1650_v61 = vpop.eup %1649  ;;  %v1417_v5 = vadd.f32 1.0, %v1648_v43 }
 0x317   :  { %v1652_v25 = vpop.eup %1651  ;;  %1653 = vrcp.f32 %v1416_v33  ;;  %v1418_v1 = vadd.f32 1.0, %v1650_v61  ;;  %v1339_v2 = vpop.f32.mrb[20].mxu1 }
 0x318   :  { %1655 = vrcp.f32 %v1417_v5  ;;  %v1419_v44 = vadd.f32 1.0, %v1652_v25  ;;  %v1340_v29 = vadd.f32 %v1339_v2, %v1136_v26  ;;  %v1341_v9 = vpop.f32.mrb[21].mxu1  ;;  %v969_v25 = vadd.f32 1e-05, %v961_v49 }
 0x319   :  { %1657 = vrcp.f32 %v1418_v1  ;;  %v1342_v60 = vadd.f32 %v1341_v9, %v1136_v26  ;;  %v1343_v3 = vpop.f32.mrb[22].mxu1  ;;  %v971_v1 = vadd.f32 1e-05, %v963_v36  ;;  %v970_v2 = vadd.f32 1e-05, %v962_v28 }
 0x31a   :  { %1659 = vrcp.f32 %v1419_v44  ;;  %v1372_v18 = vsub.f32 0.0, %v1340_v29  ;;  %v1344_v10 = vadd.f32 %v1343_v3, %v1141_v51  ;;  %v1345_v23 = vpop.f32.mrb[23].mxu1 }
 0x31b   :  { %1661 = vrsqrt.f32 %v967_v34  ;;  %v1373_v22 = vsub.f32 0.0, %v1342_v60  ;;  %v1346_v62 = vadd.f32 %v1345_v23, %v1141_v51 }
 0x31c   :  { %v1392_v57 = vmul.f32 1.442695, %v1372_v18  ;;  %v1374_v63 = vsub.f32 0.0, %v1344_v10  ;;  %1663 = vrsqrt.f32 %v968_v41 }
 0x31d   :  { %v1394_v56 = vmul.f32 1.442695, %v1373_v22  ;;  %v1375_v26 = vsub.f32 0.0, %v1346_v62 }
 0x31e   :  { %1665 = vpow2.f32 %v1392_v57  ;;  %v1396_v31 = vmul.f32 1.442695, %v1374_v63 }
 0x31f   :  { %1667 = vpow2.f32 %v1394_v56  ;;  %v1398_v55 = vmul.f32 1.442695, %v1375_v26 }
 0x320   :  { %1669 = vpow2.f32 %v1396_v31 }
 0x321   :  { %v1654_v51 = vpop.eup %1653  ;;  %1671 = vpow2.f32 %v1398_v55 }
 0x322   :  { %v1656_v43 = vpop.eup %1655  ;;  %v1448_v33 = vmul.f32 %v1654_v51, %v1051_v14  ;;  %1673 = vrsqrt.f32 %v969_v25 }
 0x323   :  { %v1658_v61 = vpop.eup %1657  ;;  %v1449_v17 = vmul.f32 %v1656_v43, %v1052_v35  ;;  %v1349_v50 = vpop.f32.mrb[24].mxu1  ;;  %1675 = vrsqrt.f32 %v971_v1 }
 0x324   :  { %v1660_v5 = vpop.eup %1659  ;;  %1464 = vst [vmem:[%s2772_s13] sm:$0xff] %v1448_v33  ;;  %v1450_v53 = vmul.f32 %v1658_v61, %v1053_v40  ;;  %v1350_v15 = vadd.f32 %v1349_v50, %v1146_v39  ;;  %v1351_v34 = vpop.f32.mrb[25].mxu1  ;;  %1677 = vrsqrt.f32 %v970_v2 }
 0x325   :  { %1465 = vst.msk [vmem:[%s2772_s13 + $0x8] sm:$0xff] %vm193_vm1, %v1449_v17  ;;  %v1451_v42 = vmul.f32 %v1660_v5, %v1054_v20  ;;  %v1662_v44 = vpop.eup %1661  ;;  %v1352_v37 = vadd.f32 %v1351_v34, %v1146_v39  ;;  %v1353_v29 = vpop.f32.mrb[26].mxu1 }
 0x326   :  { %1466 = vst [vmem:[%s2772_s13 + $0x10] sm:$0xff] %v1450_v53  ;;  %v1376_v9 = vsub.f32 0.0, %v1350_v15  ;;  %v1354_v48 = vadd.f32 %v1353_v29, %v1151_v27  ;;  %v1355_v41 = vpop.f32.mrb[27].mxu1  ;;  %v1664_v60 = vpop.eup %1663  ;;  %v985_v10 = vmul.f32 %v1662_v44, %v2422_v58  ;;  %v986_v62 = vmul.f32 %v1662_v44, %v2428_v30 }
 0x327   :  { %1467 = vst.msk [vmem:[%s2772_s13 + $0x18] sm:$0xff] %vm193_vm1, %v1451_v42  ;;  %v1377_v3 = vsub.f32 0.0, %v1352_v37  ;;  %v1356_v24 = vadd.f32 %v1355_v41, %v1151_v27  ;;  %v956_v39 = vpop.xlane.xlu1 %955  ;;  %v987_v16 = vmul.f32 %v1664_v60, %v2463_v8  ;;  %v988_v56 = vmul.f32 %v1664_v60, %v2466_v19 }
 0x328   :  { %v1666_v18 = vpop.eup %1665  ;;  %v1400_v23 = vmul.f32 1.442695, %v1376_v9  ;;  %v1378_v21 = vsub.f32 0.0, %v1354_v48  ;;  %v964_v31 = vmul.f32 0.0052083335, %v956_v39  ;;  %v1012_v14 = vmul.f32 %v2641_v54, %v985_v10 }
 0x329   :  { %v1668_v22 = vpop.eup %1667  ;;  %v1420_v0 = vadd.f32 1.0, %v1666_v18  ;;  %v1379_v57 = vsub.f32 0.0, %v1356_v24  ;;  %v1402_v27 = vmul.f32 1.442695, %v1377_v3  ;;  %v1013_v55 = vmul.f32 %v2645_v13, %v986_v62 }
 0x32a   :  { %v1670_v63 = vpop.eup %1669  ;;  %v1421_v26 = vadd.f32 1.0, %v1668_v22  ;;  %1679 = vpow2.f32 %v1400_v23  ;;  %v1404_v30 = vmul.f32 1.442695, %v1378_v21  ;;  %v1014_v8 = vmul.f32 %v2641_v54, %v987_v16 }
 0x32b   :  { %v1672_v7 = vpop.eup %1671  ;;  %1681 = vrcp.f32 %v1420_v0  ;;  %v1422_v58 = vadd.f32 1.0, %v1670_v63  ;;  %v1406_v51 = vmul.f32 1.442695, %v1379_v57  ;;  %v1015_v43 = vmul.f32 %v2645_v13, %v988_v56  ;;  %v1161_v28 = vpop.permute.xlu1 %1160 }
 0x32c   :  { %1683 = vrcp.f32 %v1421_v26  ;;  %v1423_v49 = vadd.f32 1.0, %v1672_v7  ;;  %v972_v40 = vadd.f32 1e-05, %v964_v31  ;;  %v1039_v20 = vadd.f32 %v2650_v11, %v1012_v14  ;;  %v1674_v53 = vpop.eup %1673 }
 0x32d   :  { %1685 = vrcp.f32 %v1422_v58  ;;  %v1359_v35 = vpop.f32.mrb[28].mxu1  ;;  %v1040_v50 = vadd.f32 %v2655_v45, %v1013_v55  ;;  %v1676_v15 = vpop.eup %1675  ;;  %v1041_v34 = vadd.f32 %v2650_v11, %v1014_v8  ;;  %v989_v60 = vmul.f32 %v1674_v53, %v2453_v52 }
 0x32e   :  { %1687 = vrcp.f32 %v1423_v49  ;;  %v1360_v19 = vadd.f32 %v1359_v35, %v1156_v6  ;;  %v1361_v36 = vpop.f32.mrb[29].mxu1  ;;  %v1678_v37 = vpop.eup %1677  ;;  %v1055_v41 = vmax.f32 %v1039_v20, 0.0  ;;  %v990_v26 = vmul.f32 %v1674_v53, %v2458_v47 }
 0x32f   :  { %1689 = vpow2.f32 %v1402_v27  ;;  %v1362_v33 = vadd.f32 %v1361_v36, %v1156_v6  ;;  %v1363_v61 = vpop.f32.mrb[30].mxu1  ;;  %v1042_v6 = vadd.f32 %v2655_v45, %v1015_v43  ;;  %v1056_v18 = vmax.f32 %v1040_v50, 0.0 }
 0x330   :  { %1691 = vpow2.f32 %v1404_v30  ;;  %v1380_v17 = vsub.f32 0.0, %v1360_v19  ;;  %v1364_v5 = vadd.f32 %v1363_v61, %v1161_v28  ;;  %v1365_v25 = vpop.f32.mrb[31].mxu1  ;;  %v1057_v39 = vmax.f32 %v1041_v34, 0.0 }
 0x331   :  { %1693 = vpow2.f32 %v1406_v51  ;;  %v1381_v1 = vsub.f32 0.0, %v1362_v33  ;;  %v1366_v42 = vadd.f32 %v1365_v25, %v1161_v28  ;;  %v1058_v0 = vmax.f32 %v1042_v6, 0.0 }
 0x332   :  { %v1408_v44 = vmul.f32 1.442695, %v1380_v17  ;;  %v1382_v2 = vsub.f32 0.0, %v1364_v5  ;;  %1695 = vrsqrt.f32 %v972_v40  ;;  %v1016_v16 = vmul.f32 %v2641_v54, %v989_v60 }
 0x333   :  { %v1410_v29 = vmul.f32 1.442695, %v1381_v1  ;;  %v1383_v9 = vsub.f32 0.0, %v1366_v42  ;;  %v991_v27 = vmul.f32 %v1678_v37, %v2489_v4  ;;  %v992_v49 = vmul.f32 %v1678_v37, %v2492_v12 }
 0x334   :  { %v1680_v48 = vpop.eup %1679  ;;  %1697 = vpow2.f32 %v1408_v44  ;;  %v1412_v3 = vmul.f32 1.442695, %v1382_v2  ;;  %v1043_v30 = vadd.f32 %v2650_v11, %v1016_v16  ;;  %v1017_v4 = vmul.f32 %v2645_v13, %v990_v26 }
 0x335   :  { %v1682_v24 = vpop.eup %1681  ;;  %v1424_v10 = vadd.f32 1.0, %v1680_v48  ;;  %1699 = vpow2.f32 %v1410_v29  ;;  %v1414_v23 = vmul.f32 1.442695, %v1383_v9  ;;  %v993_v35 = vmul.f32 %v1676_v15, %v2480_v32 }
 0x336   :  { %v1684_v21 = vpop.eup %1683  ;;  %v1452_v22 = vmul.f32 %v1682_v24, %v1055_v41  ;;  %1701 = vpow2.f32 %v1412_v3  ;;  %v1018_v19 = vmul.f32 %v2641_v54, %v991_v27  ;;  %v994_v36 = vmul.f32 %v1676_v15, %v2486_v59 }
 0x337   :  { %v1686_v62 = vpop.eup %1685  ;;  %v1453_v57 = vmul.f32 %v1684_v21, %v1056_v18  ;;  %1703 = vrcp.f32 %v1424_v10  ;;  %v1019_v43 = vmul.f32 %v2645_v13, %v992_v49  ;;  %v1059_v33 = vmax.f32 %v1043_v30, 0.0 }
 0x338   :  { %v1688_v63 = vpop.eup %1687  ;;  %1468 = vst [vmem:[%s2772_s13 + $0x20] sm:$0xff] %v1452_v22  ;;  %v1454_v52 = vmul.f32 %v1686_v62, %v1057_v39  ;;  %1705 = vpow2.f32 %v1414_v23  ;;  %v1044_v5 = vadd.f32 %v2655_v45, %v1017_v4  ;;  %v1020_v32 = vmul.f32 %v2641_v54, %v993_v35 }
 0x339   :  { %v1690_v56 = vpop.eup %1689  ;;  %1469 = vst.msk [vmem:[%s2772_s13 + $0x28] sm:$0xff] %vm193_vm1, %v1453_v57  ;;  %v1455_v7 = vmul.f32 %v1688_v63, %v1058_v0  ;;  %v1045_v50 = vadd.f32 %v2650_v11, %v1018_v19  ;;  %v1021_v42 = vmul.f32 %v2645_v13, %v994_v36  ;;  %v1046_v15 = vadd.f32 %v2655_v45, %v1019_v43 }
 0x33a   :  { %v1692_v58 = vpop.eup %1691  ;;  %1470 = vst [vmem:[%s2772_s13 + $0x30] sm:$0xff] %v1454_v52  ;;  %v1425_v31 = vadd.f32 1.0, %v1690_v56  ;;  %v1060_v44 = vmax.f32 %v1044_v5, 0.0  ;;  %v1047_v37 = vadd.f32 %v2650_v11, %v1020_v32 }
 0x33b   :  { %v1694_v14 = vpop.eup %1693  ;;  %1471 = vst.msk [vmem:[%s2772_s13 + $0x38] sm:$0xff] %vm193_vm1, %v1455_v7  ;;  %v1426_v47 = vadd.f32 1.0, %v1692_v58  ;;  %v1061_v6 = vmax.f32 %v1045_v50, 0.0  ;;  %v1048_v9 = vadd.f32 %v2655_v45, %v1021_v42  ;;  %v1062_v48 = vmax.f32 %v1046_v15, 0.0 }
 0x33c   :  { %1707 = vrcp.f32 %v1425_v31  ;;  %v1427_v55 = vadd.f32 1.0, %v1694_v14  ;;  %v1696_v51 = vpop.eup %1695  ;;  %v1063_v18 = vmax.f32 %v1047_v37, 0.0 }
 0x33d   :  { %1709 = vrcp.f32 %v1426_v47  ;;  %v995_v61 = vmul.f32 %v1696_v51, %v2618_v38  ;;  %v996_v59 = vmul.f32 %v1696_v51, %v2615_v46  ;;  %v1064_v23 = vmax.f32 %v1048_v9, 0.0 }
 0x33e   :  { %v1698_v8 = vpop.eup %1697  ;;  %1711 = vrcp.f32 %v1427_v55 }
 0x33f   :  { %v1700_v12 = vpop.eup %1699  ;;  %v1428_v40 = vadd.f32 1.0, %v1698_v8  ;;  %v1022_v34 = vmul.f32 %v2641_v54, %v995_v61  ;;  %v1023_v46 = vmul.f32 %v2645_v13, %v996_v59 }
 0x340   :  { %v1702_v28 = vpop.eup %1701  ;;  %v1429_v20 = vadd.f32 1.0, %v1700_v12 }
 0x341   :  { %v1704_v17 = vpop.eup %1703  ;;  %1713 = vrcp.f32 %v1428_v40  ;;  %v1430_v25 = vadd.f32 1.0, %v1702_v28  ;;  %v1049_v24 = vadd.f32 %v2650_v11, %v1022_v34  ;;  %v1050_v13 = vadd.f32 %v2655_v45, %v1023_v46 }
 0x342   :  { %v1706_v53 = vpop.eup %1705  ;;  %v1456_v1 = vmul.f32 %v1704_v17, %v1059_v33  ;;  %1715 = vrcp.f32 %v1429_v20 }
 0x343   :  { %1717 = vrcp.f32 %v1430_v25  ;;  %v1431_v38 = vadd.f32 1.0, %v1706_v53  ;;  %v1065_v21 = vmax.f32 %v1049_v24, 0.0  ;;  %v1066_v0 = vmax.f32 %v1050_v13, 0.0 }
 0x344   :  { %1472 = vst [vmem:[%s2772_s13 + $0x40] sm:$0xff] %v1456_v1 }
 0x345   :  { %1719 = vrcp.f32 %v1431_v38 }
 0x346   :  { %v1708_v2 = vpop.eup %1707 }
 0x347   :  { %v1710_v29 = vpop.eup %1709  ;;  %v1457_v41 = vmul.f32 %v1708_v2, %v1060_v44 }
 0x348   :  { %v1712_v60 = vpop.eup %1711  ;;  %v1458_v3 = vmul.f32 %v1710_v29, %v1061_v6 }
 0x349   :  { %1473 = vst.msk [vmem:[%s2772_s13 + $0x48] sm:$0xff] %vm193_vm1, %v1457_v41  ;;  %v1459_v54 = vmul.f32 %v1712_v60, %v1062_v48 }
 0x34a   :  { %1474 = vst [vmem:[%s2772_s13 + $0x50] sm:$0xff] %v1458_v3 }
 0x34b   :  { %v1714_v10 = vpop.eup %1713  ;;  %1475 = vst.msk [vmem:[%s2772_s13 + $0x58] sm:$0xff] %vm193_vm1, %v1459_v54 }
 0x34c   :  { %v1716_v11 = vpop.eup %1715  ;;  %v1460_v39 = vmul.f32 %v1714_v10, %v1063_v18 }
 0x34d   :  { %v1718_v22 = vpop.eup %1717  ;;  %v1461_v62 = vmul.f32 %v1716_v11, %v1064_v23 }
 0x34e   :  { %1476 = vst [vmem:[%s2772_s13 + $0x60] sm:$0xff] %v1460_v39  ;;  %v1462_v57 = vmul.f32 %v1718_v22, %v1065_v21 }
 0x34f   :  { %v1720_v63 = vpop.eup %1719  ;;  %1477 = vst.msk [vmem:[%s2772_s13 + $0x68] sm:$0xff] %vm193_vm1, %v1461_v62 }
 0x350   :  { %1478 = vst [vmem:[%s2772_s13 + $0x70] sm:$0xff] %v1462_v57  ;;  %v1463_v45 = vmul.f32 %v1720_v63, %v1066_v0 }
 0x352   :  { %1479 = vst.msk [vmem:[%s2772_s13 + $0x78] sm:$0xff] %vm193_vm1, %v1463_v45 }

</bundles_post_ra>
